<compile_context>
chip_gen: v6e
topology: v6e:2x2x1
jax: 0.10.0
libtpu: 0.0.40
codegen_flags: <defaults>
</compile_context>

<pallas_src>
import math
import jax
import jax.numpy as jnp
from jax.experimental import pallas as pl
from jax.experimental.pallas import tpu as pltpu


# ----------------------------- helpers -----------------------------

def _pick_tile(dim, target, min_steps=1):
    """Full dim when small/indivisible; optionally split so >= min_steps blocks exist."""
    t = dim if (dim <= target or dim % target != 0) else target
    if dim // t < min_steps:
        for cand in (t // 2, t // 4, t // 8):
            if cand >= 8 and cand % 8 == 0 and dim % cand == 0 and dim // cand >= min_steps:
                return cand
    return t


def _heads_per_group(NH, Dh):
    """Smallest head count whose lane width is a multiple of 128; else all heads."""
    for c in range(1, NH + 1):
        if NH % c == 0 and (c * Dh) % 128 == 0:
            return c
    return NH


def _gelu_tanh(y):
    # TODO(synk): tanh-approximation of GELU (HF BERT defaults to erf-GELU; diff ~1e-3).
    c = math.sqrt(2.0 / math.pi)
    return 0.5 * y * (1.0 + jnp.tanh(c * (y + 0.044715 * y * y * y)))


def _weight_spec(shape, index_map, k_steps):
    if k_steps >= 3:
        return pl.BlockSpec(shape, index_map, pipeline_mode=pl.Buffered(3))
    return pl.BlockSpec(shape, index_map)


# ----------------------------- Pallas kernels -----------------------------

def _linear_kernel(activation):
    """Tiled x @ W + b (bf16 in, f32 VMEM accumulator, f32 epilogue, bf16 out)."""
    def kernel(x_ref, w_ref, b_ref, o_ref, acc_ref):
        k = pl.program_id(2)

        @pl.when(k == 0)
        def _():
            acc_ref[...] = jnp.zeros_like(acc_ref)

        acc_ref[...] += jnp.dot(x_ref[...], w_ref[...],
                                preferred_element_type=jnp.float32)

        @pl.when(k == pl.num_programs(2) - 1)
        def _():
            y = acc_ref[...] + b_ref[...]
            if activation == "gelu":
                y = _gelu_tanh(y)
            o_ref[...] = y.astype(o_ref.dtype)
    return kernel


def linear(x, w, b, activation=None, out_dtype=jnp.bfloat16, tm=256, tn=256, tk=1024):
    """x: (M, K) bf16, w: (K, N) bf16, b: (N,) f32 -> (M, N) out_dtype."""
    M, K = x.shape
    N = w.shape[1]
    tm = _pick_tile(M, tm, min_steps=2)
    tn = _pick_tile(N, tn)
    tk = _pick_tile(K, tk)
    grid = (M // tm, N // tn, K // tk)
    transc = M * N if activation == "gelu" else 0
    cost = pl.CostEstimate(flops=2 * M * N * K, transcendentals=transc,
                           bytes_accessed=2 * (M * K + K * N + M * N) + 4 * N)
    return pl.pallas_call(
        _linear_kernel(activation),
        out_shape=jax.ShapeDtypeStruct((M, N), out_dtype),
        grid_spec=pltpu.PrefetchScalarGridSpec(
            num_scalar_prefetch=0, grid=grid,
            in_specs=[pl.BlockSpec((tm, tk), lambda i, j, k: (i, k)),
                      _weight_spec((tk, tn), lambda i, j, k: (k, j), grid[2]),
                      pl.BlockSpec((1, tn), lambda i, j, k: (0, j))],
            out_specs=pl.BlockSpec((tm, tn), lambda i, j, k: (i, j)),
            scratch_shapes=[pltpu.VMEM((tm, tn), jnp.float32)]),
        compiler_params=pltpu.CompilerParams(
            dimension_semantics=("parallel", "parallel", "arbitrary")),
        cost_estimate=cost,
    )(x, w, b.reshape(1, N))


def _qkv_kernel(H, scale):
    """Fused (H, 3H) projection; splits Q/K/V in VMEM and folds 1/sqrt(Dh) into Q."""
    def kernel(x_ref, w_ref, b_ref, q_ref, k_ref, v_ref, acc_ref):
        kk = pl.program_id(1)

        @pl.when(kk == 0)
        def _():
            acc_ref[...] = jnp.zeros_like(acc_ref)

        acc_ref[...] += jnp.dot(x_ref[...], w_ref[...],
                                preferred_element_type=jnp.float32)

        @pl.when(kk == pl.num_programs(1) - 1)
        def _():
            y = acc_ref[...] + b_ref[...]
            q_ref[...] = (y[:, :H] * scale).astype(q_ref.dtype)
            k_ref[...] = y[:, H:2 * H].astype(k_ref.dtype)
            v_ref[...] = y[:, 2 * H:3 * H].astype(v_ref.dtype)
    return kernel


def qkv_linear(x, w, b, H, scale, tm=256, tk=1024):
    """x: (M, K) bf16, w: (K, 3H) bf16, b: (3H,) f32 -> 3x (M, H) bf16 (q pre-scaled)."""
    M, K = x.shape
    tm = _pick_tile(M, tm, min_steps=2)
    tk = _pick_tile(K, tk)
    grid = (M // tm, K // tk)
    cost = pl.CostEstimate(flops=2 * M * 3 * H * K, transcendentals=0,
                           bytes_accessed=2 * (M * K + K * 3 * H + 3 * M * H) + 4 * 3 * H)
    out_sds = jax.ShapeDtypeStruct((M, H), jnp.bfloat16)
    return pl.pallas_call(
        _qkv_kernel(H, scale),
        out_shape=(out_sds, out_sds, out_sds),
        grid_spec=pltpu.PrefetchScalarGridSpec(
            num_scalar_prefetch=0, grid=grid,
            in_specs=[pl.BlockSpec((tm, tk), lambda i, k: (i, k)),
                      _weight_spec((tk, 3 * H), lambda i, k: (k, 0), grid[1]),
                      pl.BlockSpec((1, 3 * H), lambda i, k: (0, 0))],
            out_specs=(pl.BlockSpec((tm, H), lambda i, k: (i, 0)),
                       pl.BlockSpec((tm, H), lambda i, k: (i, 0)),
                       pl.BlockSpec((tm, H), lambda i, k: (i, 0))),
            scratch_shapes=[pltpu.VMEM((tm, 3 * H), jnp.float32)]),
        compiler_params=pltpu.CompilerParams(
            dimension_semantics=("parallel", "arbitrary")),
        cost_estimate=cost,
    )(x, w, b.reshape(1, 3 * H))


def _linear_add_ln_kernel(eps):
    """Fused (x @ W + b + residual) -> LayerNorm, K-reduction accumulator in VMEM."""
    def kernel(x_ref, w_ref, b_ref, r_ref, g_ref, be_ref, o_ref, acc_ref):
        k = pl.program_id(1)

        @pl.when(k == 0)
        def _():
            acc_ref[...] = jnp.zeros_like(acc_ref)

        acc_ref[...] += jnp.dot(x_ref[...], w_ref[...],
                                preferred_element_type=jnp.float32)

        @pl.when(k == pl.num_programs(1) - 1)
        def _():
            h = acc_ref[...] + b_ref[...] + r_ref[...]
            mu = jnp.mean(h, axis=-1, keepdims=True)
            var = jnp.mean(jnp.square(h - mu), axis=-1, keepdims=True)
            o_ref[...] = ((h - mu) * jax.lax.rsqrt(var + eps) * g_ref[...]
                          + be_ref[...]).astype(o_ref.dtype)
    return kernel


def linear_add_ln(x, w, b, residual, gamma, beta, eps=1e-12, tm=256, tk=1024):
    """LayerNorm(x @ W + b + residual); N (=hidden) kept whole for the LN epilogue."""
    M, K = x.shape
    N = w.shape[1]
    tm = _pick_tile(M, tm, min_steps=2)
    tk = _pick_tile(K, tk)
    grid = (M // tm, K // tk)
    cost = pl.CostEstimate(flops=2 * M * N * K + 8 * M * N, transcendentals=M,
                           bytes_accessed=2 * (M * K + K * N + 2 * M * N) + 12 * N)
    return pl.pallas_call(
        _linear_add_ln_kernel(eps),
        out_shape=jax.ShapeDtypeStruct((M, N), jnp.bfloat16),
        grid_spec=pltpu.PrefetchScalarGridSpec(
            num_scalar_prefetch=0, grid=grid,
            in_specs=[pl.BlockSpec((tm, tk), lambda i, k: (i, k)),
                      _weight_spec((tk, N), lambda i, k: (k, 0), grid[1]),
                      pl.BlockSpec((1, N), lambda i, k: (0, 0)),
                      pl.BlockSpec((tm, N), lambda i, k: (i, 0)),
                      pl.BlockSpec((1, N), lambda i, k: (0, 0)),
                      pl.BlockSpec((1, N), lambda i, k: (0, 0))],
            out_specs=pl.BlockSpec((tm, N), lambda i, k: (i, 0)),
            scratch_shapes=[pltpu.VMEM((tm, N), jnp.float32)]),
        compiler_params=pltpu.CompilerParams(
            dimension_semantics=("parallel", "arbitrary")),
        cost_estimate=cost,
    )(x, w, b.reshape(1, N), residual, gamma.reshape(1, N), beta.reshape(1, N))


def embed_ln(word_g, pos_type, gamma, beta, eps=1e-12, ts=512):
    """Fused embedding sum (word + pos + type) + LayerNorm, tiled over (batch, seq)."""
    B, S, H = word_g.shape
    ts = _pick_tile(S, ts)

    def kernel(w_ref, p_ref, g_ref, b_ref, o_ref):
        h = w_ref[...] + p_ref[...]                       # (1,ts,H) + (1,ts,H)
        mu = jnp.mean(h, axis=-1, keepdims=True)
        var = jnp.mean(jnp.square(h - mu), axis=-1, keepdims=True)
        o_ref[...] = ((h - mu) * jax.lax.rsqrt(var + eps) * g_ref[...]
                      + b_ref[...]).astype(o_ref.dtype)

    return pl.pallas_call(
        kernel,
        out_shape=jax.ShapeDtypeStruct((B, S, H), jnp.bfloat16),
        grid_spec=pltpu.PrefetchScalarGridSpec(
            num_scalar_prefetch=0, grid=(B, S // ts),
            in_specs=[pl.BlockSpec((1, ts, H), lambda b, si: (b, si, 0)),
                      pl.BlockSpec((1, ts, H), lambda b, si: (0, si, 0)),
                      pl.BlockSpec((1, 1, H), lambda b, si: (0, 0, 0)),
                      pl.BlockSpec((1, 1, H), lambda b, si: (0, 0, 0))],
            out_specs=pl.BlockSpec((1, ts, H), lambda b, si: (b, si, 0))),
        compiler_params=pltpu.CompilerParams(
            dimension_semantics=("parallel", "parallel")),
    )(word_g, pos_type, gamma.reshape(1, 1, H), beta.reshape(1, 1, H))


def _attention_kernel(hpg, Dh):
    """Flash-style MHA over KV tiles for one (batch, head-group) slice.

    q is pre-scaled by 1/sqrt(Dh); softmax state (m, l, acc) lives in VMEM scratch
    with one slot per head in the group; output written as one lane-dense group slab.
    """
    def kernel(q_ref, k_ref, v_ref, msk_ref, o_ref, m_sc, l_sc, acc_sc):
        kv = pl.program_id(2)

        @pl.when(kv == 0)
        def _():
            m_sc[...] = jnp.full_like(m_sc, -jnp.inf)
            l_sc[...] = jnp.zeros_like(l_sc)
            acc_sc[...] = jnp.zeros_like(acc_sc)

        neg = (1.0 - msk_ref[0]) * -10000.0               # (1, tkv) additive BERT mask
        q = q_ref[0]                                      # (S, GW) bf16 (already scaled)
        kb = k_ref[0]                                     # (tkv, GW) bf16
        vb = v_ref[0]

        for h in range(hpg):                              # small static unroll (<= 2 heads
            qh = q[:, h * Dh:(h + 1) * Dh]                #  per group at BERT-base)
            kh = kb[:, h * Dh:(h + 1) * Dh]
            vh = vb[:, h * Dh:(h + 1) * Dh]
            s = jax.lax.dot_general(qh, kh, (((1,), (1,)), ((), ())),
                                    preferred_element_type=jnp.float32) + neg
            m_prev = m_sc[h]                              # (S, 1)
            m_new = jnp.maximum(m_prev, jnp.max(s, axis=-1, keepdims=True))
            alpha = jnp.exp(m_prev - m_new)
            p = jnp.exp(s - m_new)
            l_sc[h] = alpha * l_sc[h] + jnp.sum(p, axis=-1, keepdims=True)
            acc_sc[h] = alpha * acc_sc[h] + jnp.dot(p.astype(jnp.bfloat16), vh,
                                                    preferred_element_type=jnp.float32)
            m_sc[h] = m_new

        @pl.when(kv == pl.num_programs(2) - 1)
        def _():
            parts = [acc_sc[h] * pl.reciprocal(l_sc[h], approx=True)
                     for h in range(hpg)]
            o_ref[0] = jnp.concatenate(parts, axis=-1).astype(o_ref.dtype)
    return kernel


def attention(q, k, v, mask3, NH):
    """q/k/v: (B, S, H) bf16 (q pre-scaled); mask3: (B, 1, S) f32 -> (B, S, H) bf16."""
    B, S, H = q.shape
    Dh = H // NH
    hpg = _heads_per_group(NH, Dh)                        # lane width multiple of 128 (or H)
    GW = hpg * Dh
    G = NH // hpg
    tkv = 256 if S % 256 == 0 else S                      # KV tile (online softmax)
    nkv = S // tkv
    return pl.pallas_call(
        _attention_kernel(hpg, Dh),
        out_shape=jax.ShapeDtypeStruct((B, S, H), jnp.bfloat16),
        grid_spec=pltpu.PrefetchScalarGridSpec(
            num_scalar_prefetch=0, grid=(B, G, nkv),
            in_specs=[pl.BlockSpec((1, S, GW), lambda b, g, kv: (b, 0, g)),
                      pl.BlockSpec((1, tkv, GW), lambda b, g, kv: (b, kv, g)),
                      pl.BlockSpec((1, tkv, GW), lambda b, g, kv: (b, kv, g)),
                      pl.BlockSpec((1, 1, tkv), lambda b, g, kv: (b, 0, kv))],
            out_specs=pl.BlockSpec((1, S, GW), lambda b, g, kv: (b, 0, g)),
            scratch_shapes=[pltpu.VMEM((hpg, S, 1), jnp.float32),
                            pltpu.VMEM((hpg, S, 1), jnp.float32),
                            pltpu.VMEM((hpg, S, Dh), jnp.float32)]),
        compiler_params=pltpu.CompilerParams(
            dimension_semantics=("parallel", "parallel", "arbitrary")),
    )(q, k, v, mask3)


def pooler_head(cls_tok, pool_w, pool_b, out_w_pad, out_b_pad):
    """Fused pooler(tanh) + dropout(identity at eval) + classifier (128-lane padded)."""
    B, H = cls_tok.shape
    NP = out_w_pad.shape[1]

    def kernel(c_ref, pw_ref, pb_ref, ow_ref, ob_ref, o_ref):
        pooled = jnp.tanh(
            jnp.dot(c_ref[...], pw_ref[...],
                    preferred_element_type=jnp.float32) + pb_ref[...])
        # nn.Dropout(p=0.3) is identity at inference (eval mode) -> no-op here.
        o_ref[...] = jnp.dot(pooled.astype(jnp.bfloat16), ow_ref[...],
                             preferred_element_type=jnp.float32) + ob_ref[...]

    return pl.pallas_call(
        kernel,
        out_shape=jax.ShapeDtypeStruct((B, NP), jnp.float32),
        in_specs=[pl.BlockSpec((B, H), lambda: (0, 0)),
                  pl.BlockSpec((H, H), lambda: (0, 0)),
                  pl.BlockSpec((1, H), lambda: (0, 0)),
                  pl.BlockSpec((H, NP), lambda: (0, 0)),
                  pl.BlockSpec((1, NP), lambda: (0, 0))],
        out_specs=pl.BlockSpec((B, NP), lambda: (0, 0)),
    )(cls_tok, pool_w, pool_b.reshape(1, H), out_w_pad, out_b_pad.reshape(1, NP))


# ------------------------------ model glue --------------------------------

def forward(params, input_ids, attention_mask, cfg):
    B, S = input_ids.shape
    H, NH = cfg["hidden"], cfg["heads"]
    scale = 1.0 / math.sqrt(H // NH)

    # Embedding gather is XLA glue; the 3-way add + LayerNorm run fused & tiled in Pallas.
    word_g = params["word_emb"][input_ids].astype(jnp.float32)              # (B,S,H)
    # TODO(synk): token_type_ids assumed all-zero (type_emb[0] for every token).
    pos_type = (params["pos_emb"][:S] + params["type_emb"][0]).reshape(1, S, H)
    x = embed_ln(word_g, pos_type, params["emb_ln_g"], params["emb_ln_b"])  # bf16
    x = x.reshape(B * S, H)                                                 # lane-dense slab

    mask3 = attention_mask.astype(jnp.float32).reshape(B, 1, S)

    for layer in params["layers"]:
        q, k, v = qkv_linear(x, layer["wqkv"], layer["bqkv"], H, scale)     # 3x (B*S,H) bf16
        ctx = attention(q.reshape(B, S, H), k.reshape(B, S, H),
                        v.reshape(B, S, H), mask3, NH)                      # (B,S,H) bf16
        x = linear_add_ln(ctx.reshape(B * S, H), layer["wo"], layer["bo"],
                          x, layer["ln1_g"], layer["ln1_b"])                # proj+add+LN
        ffn = linear(x, layer["w1"], layer["b1"], activation="gelu")        # bf16
        x = linear_add_ln(ffn, layer["w2"], layer["b2"],
                          x, layer["ln2_g"], layer["ln2_b"])                # w2+add+LN

    # TODO(synk): tiny XLA strided slice for CLS; folding it into the pooler kernel would
    # need sub-8-row blocks (not guaranteed supported) or re-reading full sequences.
    cls = x.reshape(B, S, H)[:, 0, :]                                       # (B, H) bf16
    logits_pad = pooler_head(cls, params["pool_w"], params["pool_b"],
                             params["out_w_pad"], params["out_b_pad"])      # (B, 128) f32
    return logits_pad[:, :cfg["n_classes"]]


def init_params(key, cfg):
    std = 0.02
    H, I, NC = cfg["hidden"], cfg["inter"], cfg["n_classes"]

    def dense(k, fan_in, fan_out):
        w = jax.random.normal(k, (fan_in, fan_out), jnp.float32) * std
        return w, jnp.zeros((fan_out,), jnp.float32)

    keys = jax.random.split(key, 5 + cfg["layers"])
    params = {
        "word_emb": jax.random.normal(keys[0], (cfg["vocab"], H), jnp.float32) * std,
        "pos_emb": jax.random.normal(keys[1], (cfg["max_pos"], H), jnp.float32) * std,
        "type_emb": jax.random.normal(keys[2], (2, H), jnp.float32) * std,
        "emb_ln_g": jnp.ones((H,), jnp.float32),
        "emb_ln_b": jnp.zeros((H,), jnp.float32),
    }
    layers = []
    for li in range(cfg["layers"]):
        lk = jax.random.split(keys[3 + li], 6)
        wq, bq = dense(lk[0], H, H)
        wk, bk = dense(lk[1], H, H)
        wv, bv = dense(lk[2], H, H)
        wo, bo = dense(lk[3], H, H)
        w1, b1 = dense(lk[4], H, I)
        w2, b2 = dense(lk[5], I, H)
        layers.append(dict(
            # matmul weights pre-cast to bf16 once (halves HBM->VMEM DMA, no in-kernel casts)
            wqkv=jnp.concatenate([wq, wk, wv], axis=1).astype(jnp.bfloat16),  # (H, 3H)
            bqkv=jnp.concatenate([bq, bk, bv], axis=0),                        # (3H,) f32
            wo=wo.astype(jnp.bfloat16), bo=bo,
            w1=w1.astype(jnp.bfloat16), b1=b1,
            w2=w2.astype(jnp.bfloat16), b2=b2,
            ln1_g=jnp.ones((H,), jnp.float32), ln1_b=jnp.zeros((H,), jnp.float32),
            ln2_g=jnp.ones((H,), jnp.float32), ln2_b=jnp.zeros((H,), jnp.float32)))
    params["layers"] = layers
    pool_w, pool_b = dense(keys[3 + cfg["layers"]], H, H)
    params["pool_w"], params["pool_b"] = pool_w.astype(jnp.bfloat16), pool_b
    out_w, out_b = dense(keys[4 + cfg["layers"]], H, NC)
    NP = max(128, NC)                                        # lane-dense classifier head
    params["out_w_pad"] = (jnp.zeros((H, NP), jnp.float32).at[:, :NC].set(out_w)
                           ).astype(jnp.bfloat16)
    params["out_b_pad"] = jnp.zeros((NP,), jnp.float32).at[:NC].set(out_b)
    return params


if __name__ == "__main__":
    cfg = dict(vocab=100, max_pos=8, hidden=32, heads=4, inter=64,
               layers=2, n_classes=3)
    key = jax.random.PRNGKey(0)
    pkey, ikey = jax.random.split(key)
    params = init_params(pkey, cfg)

    B, S = 2, 8
    input_ids = jax.random.randint(ikey, (B, S), 0, cfg["vocab"], dtype=jnp.int32)
    attention_mask = jnp.concatenate(
        [jnp.ones((B, 6), jnp.int32), jnp.zeros((B, 2), jnp.int32)], axis=1)

    run = jax.jit(lambda p, ids, m: forward(p, ids, m, cfg))
    logits = run(params, input_ids, attention_mask)
    logits = jax.block_until_ready(logits)
    assert logits.shape == (B, cfg["n_classes"])
    assert bool(jnp.all(jnp.isfinite(logits)))
    print("KERNEL_OK")
</pallas_src>

<mosaic_0001>
module attributes {stable_mosaic.version = 11 : i64} {
  func.func @kernel(%arg0: i32, %arg1: i32, %arg2: memref<1x8x32xf32, #tpu.memory_space<vmem>>, %arg3: memref<1x8x32xf32, #tpu.memory_space<vmem>>, %arg4: memref<1x1x32xf32, #tpu.memory_space<vmem>>, %arg5: memref<1x1x32xf32, #tpu.memory_space<vmem>>, %arg6: memref<1x8x32xbf16, #tpu.memory_space<vmem>>) attributes {dimension_semantics = [#tpu.dimension_semantics<parallel>, #tpu.dimension_semantics<parallel>], iteration_bounds = array<i64: 2, 1>, scalar_prefetch = 0 : i64, scratch_operands = 0 : i64, tpu.core_type = #tpu.core_type<tc>, window_params = [{transform_indices = @transform_0, window_bounds = array<i64: 1, 8, 32>}, {transform_indices = @transform_1, window_bounds = array<i64: 1, 8, 32>}, {pipeline_mode = #tpu.pipeline_mode<synchronous>, transform_indices = @transform_2, window_bounds = array<i64: 1, 1, 32>}, {pipeline_mode = #tpu.pipeline_mode<synchronous>, transform_indices = @transform_3, window_bounds = array<i64: 1, 1, 32>}, {transform_indices = @transform_4, window_bounds = array<i64: 1, 8, 32>}]} {
    %c0 = arith.constant 0 : index
    %c0_0 = arith.constant 0 : index
    %c0_1 = arith.constant 0 : index
    %0 = vector.load %arg2[%c0, %c0_0, %c0_1] : memref<1x8x32xf32, #tpu.memory_space<vmem>>, vector<1x8x32xf32>
    %c0_2 = arith.constant 0 : index
    %c0_3 = arith.constant 0 : index
    %c0_4 = arith.constant 0 : index
    %1 = vector.load %arg3[%c0_2, %c0_3, %c0_4] : memref<1x8x32xf32, #tpu.memory_space<vmem>>, vector<1x8x32xf32>
    %2 = arith.addf %0, %1 : vector<1x8x32xf32>
    %cst = arith.constant dense<0.000000e+00> : vector<1x8xf32>
    %3 = vector.multi_reduction <add>, %2, %cst [2] : vector<1x8x32xf32> to vector<1x8xf32>
    %4 = vector.shape_cast %3 : vector<1x8xf32> to vector<1x8x1xf32>
    %cst_5 = arith.constant 3.200000e+01 : f32
    %5 = vector.broadcast %cst_5 : f32 to vector<1x8x1xf32>
    %6 = arith.divf %4, %5 : vector<1x8x1xf32>
    %7 = vector.broadcast %6 : vector<1x8x1xf32> to vector<1x8x32xf32>
    %8 = arith.subf %2, %7 : vector<1x8x32xf32>
    %9 = arith.mulf %8, %8 : vector<1x8x32xf32>
    %cst_6 = arith.constant dense<0.000000e+00> : vector<1x8xf32>
    %10 = vector.multi_reduction <add>, %9, %cst_6 [2] : vector<1x8x32xf32> to vector<1x8xf32>
    %11 = vector.shape_cast %10 : vector<1x8xf32> to vector<1x8x1xf32>
    %cst_7 = arith.constant 3.200000e+01 : f32
    %12 = vector.broadcast %cst_7 : f32 to vector<1x8x1xf32>
    %13 = arith.divf %11, %12 : vector<1x8x1xf32>
    %14 = vector.broadcast %6 : vector<1x8x1xf32> to vector<1x8x32xf32>
    %15 = arith.subf %2, %14 : vector<1x8x32xf32>
    %cst_8 = arith.constant 9.99999996E-13 : f32
    %16 = vector.broadcast %cst_8 : f32 to vector<1x8x1xf32>
    %17 = arith.addf %13, %16 : vector<1x8x1xf32>
    %18 = math.rsqrt %17 : vector<1x8x1xf32>
    %19 = vector.broadcast %18 : vector<1x8x1xf32> to vector<1x8x32xf32>
    %20 = arith.mulf %15, %19 : vector<1x8x32xf32>
    %c0_9 = arith.constant 0 : index
    %c0_10 = arith.constant 0 : index
    %c0_11 = arith.constant 0 : index
    %21 = vector.load %arg4[%c0_9, %c0_10, %c0_11] : memref<1x1x32xf32, #tpu.memory_space<vmem>>, vector<1x1x32xf32>
    %22 = vector.broadcast %21 : vector<1x1x32xf32> to vector<1x8x32xf32>
    %23 = arith.mulf %20, %22 : vector<1x8x32xf32>
    %c0_12 = arith.constant 0 : index
    %c0_13 = arith.constant 0 : index
    %c0_14 = arith.constant 0 : index
    %24 = vector.load %arg5[%c0_12, %c0_13, %c0_14] : memref<1x1x32xf32, #tpu.memory_space<vmem>>, vector<1x1x32xf32>
    %25 = vector.broadcast %24 : vector<1x1x32xf32> to vector<1x8x32xf32>
    %26 = arith.addf %23, %25 : vector<1x8x32xf32>
    %27 = arith.truncf %26 : vector<1x8x32xf32> to vector<1x8x32xbf16>
    %c0_15 = arith.constant 0 : index
    %c0_16 = arith.constant 0 : index
    %c0_17 = arith.constant 0 : index
    %28 = vector.load %arg6[%c0_15, %c0_16, %c0_17] : memref<1x8x32xbf16, #tpu.memory_space<vmem>>, vector<1x8x32xbf16>
    tpu.vector_store %arg6[%c0_15, %c0_16, %c0_17], %27 {strides = array<i32>} : memref<1x8x32xbf16, #tpu.memory_space<vmem>>, vector<1x8x32xbf16>,
    return
  }
  func.func @transform_0(%arg0: i32, %arg1: i32) -> (i32, i32, i32) {
    %c0_i32 = arith.constant 0 : i32
    %c0_i32_0 = arith.constant 0 : i32
    return %arg0, %arg1, %c0_i32 : i32, i32, i32
  }
  func.func @transform_1(%arg0: i32, %arg1: i32) -> (i32, i32, i32) {
    %c0_i32 = arith.constant 0 : i32
    %c0_i32_0 = arith.constant 0 : i32
    %c0_i32_1 = arith.constant 0 : i32
    return %c0_i32, %arg1, %c0_i32_0 : i32, i32, i32
  }
  func.func @transform_2(%arg0: i32, %arg1: i32) -> (i32, i32, i32) {
    %c0_i32 = arith.constant 0 : i32
    %c0_i32_0 = arith.constant 0 : i32
    %c0_i32_1 = arith.constant 0 : i32
    %c0_i32_2 = arith.constant 0 : i32
    return %c0_i32, %c0_i32_0, %c0_i32_1 : i32, i32, i32
  }
  func.func @transform_3(%arg0: i32, %arg1: i32) -> (i32, i32, i32) {
    %c0_i32 = arith.constant 0 : i32
    %c0_i32_0 = arith.constant 0 : i32
    %c0_i32_1 = arith.constant 0 : i32
    %c0_i32_2 = arith.constant 0 : i32
    return %c0_i32, %c0_i32_0, %c0_i32_1 : i32, i32, i32
  }
  func.func @transform_4(%arg0: i32, %arg1: i32) -> (i32, i32, i32) {
    %c0_i32 = arith.constant 0 : i32
    %c0_i32_0 = arith.constant 0 : i32
    return %arg0, %arg1, %c0_i32 : i32, i32, i32
  }
}

module attributes {stable_mosaic.version = 11 : i64} {
  func.func @kernel(%arg0: i32, %arg1: i32, %arg2: memref<8x32xbf16, #tpu.memory_space<vmem>>, %arg3: memref<32x96xbf16, #tpu.memory_space<vmem>>, %arg4: memref<1x96xf32, #tpu.memory_space<vmem>>, %arg5: memref<8x32xbf16, #tpu.memory_space<vmem>>, %arg6: memref<8x32xbf16, #tpu.memory_space<vmem>>, %arg7: memref<8x32xbf16, #tpu.memory_space<vmem>>, %arg8: memref<8x96xf32, #tpu.memory_space<vmem>>) attributes {dimension_semantics = [#tpu.dimension_semantics<parallel>, #tpu.dimension_semantics<arbitrary>], iteration_bounds = array<i64: 2, 1>, scalar_prefetch = 0 : i64, scratch_operands = 1 : i64, tpu.core_type = #tpu.core_type<tc>, window_params = [{transform_indices = @transform_0, window_bounds = array<i64: 8, 32>}, {transform_indices = @transform_1, window_bounds = array<i64: 32, 96>}, {pipeline_mode = #tpu.pipeline_mode<synchronous>, transform_indices = @transform_2, window_bounds = array<i64: 1, 96>}, {transform_indices = @transform_3, window_bounds = array<i64: 8, 32>}, {transform_indices = @transform_4, window_bounds = array<i64: 8, 32>}, {transform_indices = @transform_5, window_bounds = array<i64: 8, 32>}]} {
    %c0_i32 = arith.constant 0 : i32
    %0 = arith.cmpi eq, %arg1, %c0_i32 : i32
    %1 = arith.extui %0 : i1 to i32
    %c0_i32_0 = arith.constant 0 : i32
    %2 = arith.cmpi ne, %1, %c0_i32_0 : i32
    scf.if %2 {
      %cst_10 = arith.constant 0.000000e+00 : f32
      %12 = vector.broadcast %cst_10 : f32 to vector<8x96xf32>
      %c0_11 = arith.constant 0 : index
      %c0_12 = arith.constant 0 : index
      %13 = vector.load %arg8[%c0_11, %c0_12] : memref<8x96xf32, #tpu.memory_space<vmem>>, vector<8x96xf32>
      tpu.vector_store %arg8[%c0_11, %c0_12], %12 {strides = array<i32>} : memref<8x96xf32, #tpu.memory_space<vmem>>, vector<8x96xf32>,
    } else {
    }
    %c0 = arith.constant 0 : index
    %c0_1 = arith.constant 0 : index
    %3 = vector.load %arg8[%c0, %c0_1] : memref<8x96xf32, #tpu.memory_space<vmem>>, vector<8x96xf32>
    %c0_2 = arith.constant 0 : index
    %c0_3 = arith.constant 0 : index
    %4 = vector.load %arg2[%c0_2, %c0_3] : memref<8x32xbf16, #tpu.memory_space<vmem>>, vector<8x32xbf16>
    %c0_4 = arith.constant 0 : index
    %c0_5 = arith.constant 0 : index
    %5 = vector.load %arg3[%c0_4, %c0_5] : memref<32x96xbf16, #tpu.memory_space<vmem>>, vector<32x96xbf16>
    %cst = arith.constant dense<0.000000e+00> : vector<8x96xf32>
    %6 = tpu.matmul %4, %5, %cst {dimension_numbers = #tpu.dot_dimension_numbers<[1], [0], [0], [1], [0, 0, 1, 1], [], []>} : vector<8x32xbf16>, vector<32x96xbf16>, vector<8x96xf32> -> vector<8x96xf32>
    %7 = arith.addf %3, %6 : vector<8x96xf32>
    %c0_6 = arith.constant 0 : index
    %c0_7 = arith.constant 0 : index
    %8 = vector.load %arg8[%c0_6, %c0_7] : memref<8x96xf32, #tpu.memory_space<vmem>>, vector<8x96xf32>
    tpu.vector_store %arg8[%c0_6, %c0_7], %7 {strides = array<i32>} : memref<8x96xf32, #tpu.memory_space<vmem>>, vector<8x96xf32>,
    %c0_i32_8 = arith.constant 0 : i32
    %9 = arith.cmpi eq, %arg1, %c0_i32_8 : i32
    %10 = arith.extui %9 : i1 to i32
    %c0_i32_9 = arith.constant 0 : i32
    %11 = arith.cmpi ne, %10, %c0_i32_9 : i32
    scf.if %11 {
      %c0_10 = arith.constant 0 : index
      %c0_11 = arith.constant 0 : index
      %12 = vector.load %arg8[%c0_10, %c0_11] : memref<8x96xf32, #tpu.memory_space<vmem>>, vector<8x96xf32>
      %c0_12 = arith.constant 0 : index
      %c0_13 = arith.constant 0 : index
      %13 = vector.load %arg4[%c0_12, %c0_13] : memref<1x96xf32, #tpu.memory_space<vmem>>, vector<1x96xf32>
      %14 = vector.broadcast %13 : vector<1x96xf32> to vector<8x96xf32>
      %15 = arith.addf %12, %14 : vector<8x96xf32>
      %16 = vector.extract_strided_slice %15 {offsets = [0, 0], sizes = [8, 32], strides = [1, 1]} : vector<8x96xf32> to vector<8x32xf32>
      %cst_14 = arith.constant 0.353553385 : f32
      %17 = vector.broadcast %cst_14 : f32 to vector<8x32xf32>
      %18 = arith.mulf %16, %17 : vector<8x32xf32>
      %19 = arith.truncf %18 : vector<8x32xf32> to vector<8x32xbf16>
      %c0_15 = arith.constant 0 : index
      %c0_16 = arith.constant 0 : index
      %20 = vector.load %arg5[%c0_15, %c0_16] : memref<8x32xbf16, #tpu.memory_space<vmem>>, vector<8x32xbf16>
      tpu.vector_store %arg5[%c0_15, %c0_16], %19 {strides = array<i32>} : memref<8x32xbf16, #tpu.memory_space<vmem>>, vector<8x32xbf16>,
      %21 = vector.extract_strided_slice %15 {offsets = [0, 32], sizes = [8, 32], strides = [1, 1]} : vector<8x96xf32> to vector<8x32xf32>
      %22 = arith.truncf %21 : vector<8x32xf32> to vector<8x32xbf16>
      %c0_17 = arith.constant 0 : index
      %c0_18 = arith.constant 0 : index
      %23 = vector.load %arg6[%c0_17, %c0_18] : memref<8x32xbf16, #tpu.memory_space<vmem>>, vector<8x32xbf16>
      tpu.vector_store %arg6[%c0_17, %c0_18], %22 {strides = array<i32>} : memref<8x32xbf16, #tpu.memory_space<vmem>>, vector<8x32xbf16>,
      %24 = vector.extract_strided_slice %15 {offsets = [0, 64], sizes = [8, 32], strides = [1, 1]} : vector<8x96xf32> to vector<8x32xf32>
      %25 = arith.truncf %24 : vector<8x32xf32> to vector<8x32xbf16>
      %c0_19 = arith.constant 0 : index
      %c0_20 = arith.constant 0 : index
      %26 = vector.load %arg7[%c0_19, %c0_20] : memref<8x32xbf16, #tpu.memory_space<vmem>>, vector<8x32xbf16>
      tpu.vector_store %arg7[%c0_19, %c0_20], %25 {strides = array<i32>} : memref<8x32xbf16, #tpu.memory_space<vmem>>, vector<8x32xbf16>,
    } else {
    }
    return
  }
  func.func @transform_0(%arg0: i32, %arg1: i32) -> (i32, i32) {
    %c0_i32 = arith.constant 0 : i32
    return %arg0, %arg1 : i32, i32
  }
  func.func @transform_1(%arg0: i32, %arg1: i32) -> (i32, i32) {
    %c0_i32 = arith.constant 0 : i32
    %c0_i32_0 = arith.constant 0 : i32
    return %arg1, %c0_i32 : i32, i32
  }
  func.func @transform_2(%arg0: i32, %arg1: i32) -> (i32, i32) {
    %c0_i32 = arith.constant 0 : i32
    %c0_i32_0 = arith.constant 0 : i32
    %c0_i32_1 = arith.constant 0 : i32
    return %c0_i32, %c0_i32_0 : i32, i32
  }
  func.func @transform_3(%arg0: i32, %arg1: i32) -> (i32, i32) {
    %c0_i32 = arith.constant 0 : i32
    %c0_i32_0 = arith.constant 0 : i32
    return %arg0, %c0_i32 : i32, i32
  }
  func.func @transform_4(%arg0: i32, %arg1: i32) -> (i32, i32) {
    %c0_i32 = arith.constant 0 : i32
    %c0_i32_0 = arith.constant 0 : i32
    return %arg0, %c0_i32 : i32, i32
  }
  func.func @transform_5(%arg0: i32, %arg1: i32) -> (i32, i32) {
    %c0_i32 = arith.constant 0 : i32
    %c0_i32_0 = arith.constant 0 : i32
    return %arg0, %c0_i32 : i32, i32
  }
}

module attributes {stable_mosaic.version = 11 : i64} {
  func.func @kernel(%arg0: i32, %arg1: i32, %arg2: memref<8x32xbf16, #tpu.memory_space<vmem>>, %arg3: memref<32x32xbf16, #tpu.memory_space<vmem>>, %arg4: memref<1x32xf32, #tpu.memory_space<vmem>>, %arg5: memref<8x32xbf16, #tpu.memory_space<vmem>>, %arg6: memref<1x32xf32, #tpu.memory_space<vmem>>, %arg7: memref<1x32xf32, #tpu.memory_space<vmem>>, %arg8: memref<8x32xbf16, #tpu.memory_space<vmem>>, %arg9: memref<8x32xf32, #tpu.memory_space<vmem>>) attributes {dimension_semantics = [#tpu.dimension_semantics<parallel>, #tpu.dimension_semantics<arbitrary>], iteration_bounds = array<i64: 2, 1>, scalar_prefetch = 0 : i64, scratch_operands = 1 : i64, tpu.core_type = #tpu.core_type<tc>, window_params = [{transform_indices = @transform_0, window_bounds = array<i64: 8, 32>}, {transform_indices = @transform_1, window_bounds = array<i64: 32, 32>}, {pipeline_mode = #tpu.pipeline_mode<synchronous>, transform_indices = @transform_2, window_bounds = array<i64: 1, 32>}, {transform_indices = @transform_3, window_bounds = array<i64: 8, 32>}, {pipeline_mode = #tpu.pipeline_mode<synchronous>, transform_indices = @transform_4, window_bounds = array<i64: 1, 32>}, {pipeline_mode = #tpu.pipeline_mode<synchronous>, transform_indices = @transform_5, window_bounds = array<i64: 1, 32>}, {transform_indices = @transform_6, window_bounds = array<i64: 8, 32>}]} {
    %c0_i32 = arith.constant 0 : i32
    %0 = arith.cmpi eq, %arg1, %c0_i32 : i32
    %1 = arith.extui %0 : i1 to i32
    %c0_i32_0 = arith.constant 0 : i32
    %2 = arith.cmpi ne, %1, %c0_i32_0 : i32
    scf.if %2 {
      %cst_10 = arith.constant 0.000000e+00 : f32
      %12 = vector.broadcast %cst_10 : f32 to vector<8x32xf32>
      %c0_11 = arith.constant 0 : index
      %c0_12 = arith.constant 0 : index
      %13 = vector.load %arg9[%c0_11, %c0_12] : memref<8x32xf32, #tpu.memory_space<vmem>>, vector<8x32xf32>
      tpu.vector_store %arg9[%c0_11, %c0_12], %12 {strides = array<i32>} : memref<8x32xf32, #tpu.memory_space<vmem>>, vector<8x32xf32>,
    } else {
    }
    %c0 = arith.constant 0 : index
    %c0_1 = arith.constant 0 : index
    %3 = vector.load %arg9[%c0, %c0_1] : memref<8x32xf32, #tpu.memory_space<vmem>>, vector<8x32xf32>
    %c0_2 = arith.constant 0 : index
    %c0_3 = arith.constant 0 : index
    %4 = vector.load %arg2[%c0_2, %c0_3] : memref<8x32xbf16, #tpu.memory_space<vmem>>, vector<8x32xbf16>
    %c0_4 = arith.constant 0 : index
    %c0_5 = arith.constant 0 : index
    %5 = vector.load %arg3[%c0_4, %c0_5] : memref<32x32xbf16, #tpu.memory_space<vmem>>, vector<32x32xbf16>
    %cst = arith.constant dense<0.000000e+00> : vector<8x32xf32>
    %6 = tpu.matmul %4, %5, %cst {dimension_numbers = #tpu.dot_dimension_numbers<[1], [0], [0], [1], [0, 0, 1, 1], [], []>} : vector<8x32xbf16>, vector<32x32xbf16>, vector<8x32xf32> -> vector<8x32xf32>
    %7 = arith.addf %3, %6 : vector<8x32xf32>
    %c0_6 = arith.constant 0 : index
    %c0_7 = arith.constant 0 : index
    %8 = vector.load %arg9[%c0_6, %c0_7] : memref<8x32xf32, #tpu.memory_space<vmem>>, vector<8x32xf32>
    tpu.vector_store %arg9[%c0_6, %c0_7], %7 {strides = array<i32>} : memref<8x32xf32, #tpu.memory_space<vmem>>, vector<8x32xf32>,
    %c0_i32_8 = arith.constant 0 : i32
    %9 = arith.cmpi eq, %arg1, %c0_i32_8 : i32
    %10 = arith.extui %9 : i1 to i32
    %c0_i32_9 = arith.constant 0 : i32
    %11 = arith.cmpi ne, %10, %c0_i32_9 : i32
    scf.if %11 {
      %c0_10 = arith.constant 0 : index
      %c0_11 = arith.constant 0 : index
      %12 = vector.load %arg9[%c0_10, %c0_11] : memref<8x32xf32, #tpu.memory_space<vmem>>, vector<8x32xf32>
      %c0_12 = arith.constant 0 : index
      %c0_13 = arith.constant 0 : index
      %13 = vector.load %arg4[%c0_12, %c0_13] : memref<1x32xf32, #tpu.memory_space<vmem>>, vector<1x32xf32>
      %14 = vector.broadcast %13 : vector<1x32xf32> to vector<8x32xf32>
      %15 = arith.addf %12, %14 : vector<8x32xf32>
      %c0_14 = arith.constant 0 : index
      %c0_15 = arith.constant 0 : index
      %16 = vector.load %arg5[%c0_14, %c0_15] : memref<8x32xbf16, #tpu.memory_space<vmem>>, vector<8x32xbf16>
      %17 = arith.extf %16 : vector<8x32xbf16> to vector<8x32xf32>
      %18 = arith.addf %15, %17 : vector<8x32xf32>
      %cst_16 = arith.constant dense<0.000000e+00> : vector<8xf32>
      %19 = vector.multi_reduction <add>, %18, %cst_16 [1] : vector<8x32xf32> to vector<8xf32>
      %20 = vector.shape_cast %19 : vector<8xf32> to vector<8x1xf32>
      %cst_17 = arith.constant 3.200000e+01 : f32
      %21 = vector.broadcast %cst_17 : f32 to vector<8x1xf32>
      %22 = arith.divf %20, %21 : vector<8x1xf32>
      %23 = vector.broadcast %22 : vector<8x1xf32> to vector<8x32xf32>
      %24 = arith.subf %18, %23 : vector<8x32xf32>
      %25 = arith.mulf %24, %24 : vector<8x32xf32>
      %cst_18 = arith.constant dense<0.000000e+00> : vector<8xf32>
      %26 = vector.multi_reduction <add>, %25, %cst_18 [1] : vector<8x32xf32> to vector<8xf32>
      %27 = vector.shape_cast %26 : vector<8xf32> to vector<8x1xf32>
      %cst_19 = arith.constant 3.200000e+01 : f32
      %28 = vector.broadcast %cst_19 : f32 to vector<8x1xf32>
      %29 = arith.divf %27, %28 : vector<8x1xf32>
      %30 = vector.broadcast %22 : vector<8x1xf32> to vector<8x32xf32>
      %31 = arith.subf %18, %30 : vector<8x32xf32>
      %cst_20 = arith.constant 9.99999996E-13 : f32
      %32 = vector.broadcast %cst_20 : f32 to vector<8x1xf32>
      %33 = arith.addf %29, %32 : vector<8x1xf32>
      %34 = math.rsqrt %33 : vector<8x1xf32>
      %35 = vector.broadcast %34 : vector<8x1xf32> to vector<8x32xf32>
      %36 = arith.mulf %31, %35 : vector<8x32xf32>
      %c0_21 = arith.constant 0 : index
      %c0_22 = arith.constant 0 : index
      %37 = vector.load %arg6[%c0_21, %c0_22] : memref<1x32xf32, #tpu.memory_space<vmem>>, vector<1x32xf32>
      %38 = vector.broadcast %37 : vector<1x32xf32> to vector<8x32xf32>
      %39 = arith.mulf %36, %38 : vector<8x32xf32>
      %c0_23 = arith.constant 0 : index
      %c0_24 = arith.constant 0 : index
      %40 = vector.load %arg7[%c0_23, %c0_24] : memref<1x32xf32, #tpu.memory_space<vmem>>, vector<1x32xf32>
      %41 = vector.broadcast %40 : vector<1x32xf32> to vector<8x32xf32>
      %42 = arith.addf %39, %41 : vector<8x32xf32>
      %43 = arith.truncf %42 : vector<8x32xf32> to vector<8x32xbf16>
      %c0_25 = arith.constant 0 : index
      %c0_26 = arith.constant 0 : index
      %44 = vector.load %arg8[%c0_25, %c0_26] : memref<8x32xbf16, #tpu.memory_space<vmem>>, vector<8x32xbf16>
      tpu.vector_store %arg8[%c0_25, %c0_26], %43 {strides = array<i32>} : memref<8x32xbf16, #tpu.memory_space<vmem>>, vector<8x32xbf16>,
    } else {
    }
    return
  }
  func.func @transform_0(%arg0: i32, %arg1: i32) -> (i32, i32) {
    %c0_i32 = arith.constant 0 : i32
    return %arg0, %arg1 : i32, i32
  }
  func.func @transform_1(%arg0: i32, %arg1: i32) -> (i32, i32) {
    %c0_i32 = arith.constant 0 : i32
    %c0_i32_0 = arith.constant 0 : i32
    return %arg1, %c0_i32 : i32, i32
  }
  func.func @transform_2(%arg0: i32, %arg1: i32) -> (i32, i32) {
    %c0_i32 = arith.constant 0 : i32
    %c0_i32_0 = arith.constant 0 : i32
    %c0_i32_1 = arith.constant 0 : i32
    return %c0_i32, %c0_i32_0 : i32, i32
  }
  func.func @transform_3(%arg0: i32, %arg1: i32) -> (i32, i32) {
    %c0_i32 = arith.constant 0 : i32
    %c0_i32_0 = arith.constant 0 : i32
    return %arg0, %c0_i32 : i32, i32
  }
  func.func @transform_4(%arg0: i32, %arg1: i32) -> (i32, i32) {
    %c0_i32 = arith.constant 0 : i32
    %c0_i32_0 = arith.constant 0 : i32
    %c0_i32_1 = arith.constant 0 : i32
    return %c0_i32, %c0_i32_0 : i32, i32
  }
  func.func @transform_5(%arg0: i32, %arg1: i32) -> (i32, i32) {
    %c0_i32 = arith.constant 0 : i32
    %c0_i32_0 = arith.constant 0 : i32
    %c0_i32_1 = arith.constant 0 : i32
    return %c0_i32, %c0_i32_0 : i32, i32
  }
  func.func @transform_6(%arg0: i32, %arg1: i32) -> (i32, i32) {
    %c0_i32 = arith.constant 0 : i32
    %c0_i32_0 = arith.constant 0 : i32
    return %arg0, %c0_i32 : i32, i32
  }
}

module attributes {stable_mosaic.version = 11 : i64} {
  func.func @kernel(%arg0: i32, %arg1: i32, %arg2: i32, %arg3: memref<1x8x32xbf16, #tpu.memory_space<vmem>>, %arg4: memref<1x8x32xbf16, #tpu.memory_space<vmem>>, %arg5: memref<1x8x32xbf16, #tpu.memory_space<vmem>>, %arg6: memref<1x1x8xf32, #tpu.memory_space<vmem>>, %arg7: memref<1x8x32xbf16, #tpu.memory_space<vmem>>, %arg8: memref<4x8x1xf32, #tpu.memory_space<vmem>>, %arg9: memref<4x8x1xf32, #tpu.memory_space<vmem>>, %arg10: memref<4x8x8xf32, #tpu.memory_space<vmem>>) attributes {dimension_semantics = [#tpu.dimension_semantics<parallel>, #tpu.dimension_semantics<parallel>, #tpu.dimension_semantics<arbitrary>], iteration_bounds = array<i64: 2, 1, 1>, scalar_prefetch = 0 : i64, scratch_operands = 3 : i64, tpu.core_type = #tpu.core_type<tc>, window_params = [{transform_indices = @transform_0, window_bounds = array<i64: 1, 8, 32>}, {transform_indices = @transform_1, window_bounds = array<i64: 1, 8, 32>}, {transform_indices = @transform_2, window_bounds = array<i64: 1, 8, 32>}, {transform_indices = @transform_3, window_bounds = array<i64: 1, 1, 8>}, {transform_indices = @transform_4, window_bounds = array<i64: 1, 8, 32>}]} {
    %c0_i32 = arith.constant 0 : i32
    %0 = arith.cmpi eq, %arg2, %c0_i32 : i32
    %1 = arith.extui %0 : i1 to i32
    %c0_i32_0 = arith.constant 0 : i32
    %2 = arith.cmpi ne, %1, %c0_i32_0 : i32
    scf.if %2 {
      %cst_100 = arith.constant 0xFF800000 : f32
      %170 = vector.broadcast %cst_100 : f32 to vector<4x8x1xf32>
      %c0_101 = arith.constant 0 : index
      %c0_102 = arith.constant 0 : index
      %c0_103 = arith.constant 0 : index
      %171 = vector.load %arg8[%c0_101, %c0_102, %c0_103] : memref<4x8x1xf32, #tpu.memory_space<vmem>>, vector<4x8x1xf32>
      tpu.vector_store %arg8[%c0_101, %c0_102, %c0_103], %170 {strides = array<i32>} : memref<4x8x1xf32, #tpu.memory_space<vmem>>, vector<4x8x1xf32>,
      %cst_104 = arith.constant 0.000000e+00 : f32
      %172 = vector.broadcast %cst_104 : f32 to vector<4x8x1xf32>
      %c0_105 = arith.constant 0 : index
      %c0_106 = arith.constant 0 : index
      %c0_107 = arith.constant 0 : index
      %173 = vector.load %arg9[%c0_105, %c0_106, %c0_107] : memref<4x8x1xf32, #tpu.memory_space<vmem>>, vector<4x8x1xf32>
      tpu.vector_store %arg9[%c0_105, %c0_106, %c0_107], %172 {strides = array<i32>} : memref<4x8x1xf32, #tpu.memory_space<vmem>>, vector<4x8x1xf32>,
      %cst_108 = arith.constant 0.000000e+00 : f32
      %174 = vector.broadcast %cst_108 : f32 to vector<4x8x8xf32>
      %c0_109 = arith.constant 0 : index
      %c0_110 = arith.constant 0 : index
      %c0_111 = arith.constant 0 : index
      %175 = vector.load %arg10[%c0_109, %c0_110, %c0_111] : memref<4x8x8xf32, #tpu.memory_space<vmem>>, vector<4x8x8xf32>
      tpu.vector_store %arg10[%c0_109, %c0_110, %c0_111], %174 {strides = array<i32>} : memref<4x8x8xf32, #tpu.memory_space<vmem>>, vector<4x8x8xf32>,
    } else {
    }
    %c0 = arith.constant 0 : index
    %c0_1 = arith.constant 0 : index
    %c0_2 = arith.constant 0 : index
    %3 = vector.load %arg6[%c0, %c0_1, %c0_2] : memref<1x1x8xf32, #tpu.memory_space<vmem>>, vector<1x1x8xf32>
    %4 = vector.shape_cast %3 : vector<1x1x8xf32> to vector<1x8xf32>
    %cst = arith.constant 1.000000e+00 : f32
    %5 = vector.broadcast %cst : f32 to vector<1x8xf32>
    %6 = arith.subf %5, %4 : vector<1x8xf32>
    %cst_3 = arith.constant -1.000000e+04 : f32
    %7 = vector.broadcast %cst_3 : f32 to vector<1x8xf32>
    %8 = arith.mulf %6, %7 : vector<1x8xf32>
    %c0_4 = arith.constant 0 : index
    %c0_5 = arith.constant 0 : index
    %c0_6 = arith.constant 0 : index
    %9 = vector.load %arg3[%c0_4, %c0_5, %c0_6] : memref<1x8x32xbf16, #tpu.memory_space<vmem>>, vector<1x8x32xbf16>
    %10 = vector.shape_cast %9 : vector<1x8x32xbf16> to vector<8x32xbf16>
    %c0_7 = arith.constant 0 : index
    %c0_8 = arith.constant 0 : index
    %c0_9 = arith.constant 0 : index
    %11 = vector.load %arg4[%c0_7, %c0_8, %c0_9] : memref<1x8x32xbf16, #tpu.memory_space<vmem>>, vector<1x8x32xbf16>
    %12 = vector.shape_cast %11 : vector<1x8x32xbf16> to vector<8x32xbf16>
    %c0_10 = arith.constant 0 : index
    %c0_11 = arith.constant 0 : index
    %c0_12 = arith.constant 0 : index
    %13 = vector.load %arg5[%c0_10, %c0_11, %c0_12] : memref<1x8x32xbf16, #tpu.memory_space<vmem>>, vector<1x8x32xbf16>
    %14 = vector.shape_cast %13 : vector<1x8x32xbf16> to vector<8x32xbf16>
    %15 = vector.extract_strided_slice %10 {offsets = [0, 0], sizes = [8, 8], strides = [1, 1]} : vector<8x32xbf16> to vector<8x8xbf16>
    %16 = vector.extract_strided_slice %12 {offsets = [0, 0], sizes = [8, 8], strides = [1, 1]} : vector<8x32xbf16> to vector<8x8xbf16>
    %17 = vector.extract_strided_slice %14 {offsets = [0, 0], sizes = [8, 8], strides = [1, 1]} : vector<8x32xbf16> to vector<8x8xbf16>
    %cst_13 = arith.constant dense<0.000000e+00> : vector<8x8xf32>
    %18 = tpu.matmul %15, %16, %cst_13 {dimension_numbers = #tpu.dot_dimension_numbers<[1], [1], [0], [0], [0, 0, 1, 0], [], []>} : vector<8x8xbf16>, vector<8x8xbf16>, vector<8x8xf32> -> vector<8x8xf32>
    %19 = vector.broadcast %8 : vector<1x8xf32> to vector<8x8xf32>
    %20 = arith.addf %18, %19 : vector<8x8xf32>
    %c0_14 = arith.constant 0 : index
    %c0_15 = arith.constant 0 : index
    %c0_16 = arith.constant 0 : index
    %21 = vector.load %arg8[%c0_14, %c0_15, %c0_16] : memref<4x8x1xf32, #tpu.memory_space<vmem>>, vector<1x8x1xf32>
    %22 = vector.shape_cast %21 : vector<1x8x1xf32> to vector<8x1xf32>
    %cst_17 = arith.constant dense<0xFF800000> : vector<8xf32>
    %23 = vector.multi_reduction <maximumf>, %20, %cst_17 [1] : vector<8x8xf32> to vector<8xf32>
    %24 = vector.shape_cast %23 : vector<8xf32> to vector<8x1xf32>
    %25 = arith.maximumf %22, %24 : vector<8x1xf32>
    %26 = arith.subf %22, %25 : vector<8x1xf32>
    %27 = math.exp %26 : vector<8x1xf32>
    %28 = vector.broadcast %25 : vector<8x1xf32> to vector<8x8xf32>
    %29 = arith.subf %20, %28 : vector<8x8xf32>
    %30 = math.exp %29 : vector<8x8xf32>
    %c0_18 = arith.constant 0 : index
    %c0_19 = arith.constant 0 : index
    %c0_20 = arith.constant 0 : index
    %31 = vector.load %arg9[%c0_18, %c0_19, %c0_20] : memref<4x8x1xf32, #tpu.memory_space<vmem>>, vector<1x8x1xf32>
    %32 = vector.shape_cast %31 : vector<1x8x1xf32> to vector<8x1xf32>
    %33 = arith.mulf %27, %32 : vector<8x1xf32>
    %cst_21 = arith.constant dense<0.000000e+00> : vector<8xf32>
    %34 = vector.multi_reduction <add>, %30, %cst_21 [1] : vector<8x8xf32> to vector<8xf32>
    %35 = vector.shape_cast %34 : vector<8xf32> to vector<8x1xf32>
    %36 = arith.addf %33, %35 : vector<8x1xf32>
    %c0_22 = arith.constant 0 : index
    %c0_23 = arith.constant 0 : index
    %c0_24 = arith.constant 0 : index
    %37 = vector.load %arg9[%c0_22, %c0_23, %c0_24] : memref<4x8x1xf32, #tpu.memory_space<vmem>>, vector<1x8x1xf32>
    %38 = vector.shape_cast %37 : vector<1x8x1xf32> to vector<8x1xf32>
    %39 = vector.shape_cast %36 : vector<8x1xf32> to vector<1x8x1xf32>
    tpu.vector_store %arg9[%c0_22, %c0_23, %c0_24], %39 {strides = array<i32>} : memref<4x8x1xf32, #tpu.memory_space<vmem>>, vector<1x8x1xf32>,
    %c0_25 = arith.constant 0 : index
    %c0_26 = arith.constant 0 : index
    %c0_27 = arith.constant 0 : index
    %40 = vector.load %arg10[%c0_25, %c0_26, %c0_27] : memref<4x8x8xf32, #tpu.memory_space<vmem>>, vector<1x8x8xf32>
    %41 = vector.shape_cast %40 : vector<1x8x8xf32> to vector<8x8xf32>
    %42 = vector.broadcast %27 : vector<8x1xf32> to vector<8x8xf32>
    %43 = arith.mulf %42, %41 : vector<8x8xf32>
    %44 = arith.truncf %30 : vector<8x8xf32> to vector<8x8xbf16>
    %cst_28 = arith.constant dense<0.000000e+00> : vector<8x8xf32>
    %45 = tpu.matmul %44, %17, %cst_28 {dimension_numbers = #tpu.dot_dimension_numbers<[1], [0], [0], [1], [0, 0, 1, 1], [], []>} : vector<8x8xbf16>, vector<8x8xbf16>, vector<8x8xf32> -> vector<8x8xf32>
    %46 = arith.addf %43, %45 : vector<8x8xf32>
    %c0_29 = arith.constant 0 : index
    %c0_30 = arith.constant 0 : index
    %c0_31 = arith.constant 0 : index
    %47 = vector.load %arg10[%c0_29, %c0_30, %c0_31] : memref<4x8x8xf32, #tpu.memory_space<vmem>>, vector<1x8x8xf32>
    %48 = vector.shape_cast %47 : vector<1x8x8xf32> to vector<8x8xf32>
    %49 = vector.shape_cast %46 : vector<8x8xf32> to vector<1x8x8xf32>
    tpu.vector_store %arg10[%c0_29, %c0_30, %c0_31], %49 {strides = array<i32>} : memref<4x8x8xf32, #tpu.memory_space<vmem>>, vector<1x8x8xf32>,
    %c0_32 = arith.constant 0 : index
    %c0_33 = arith.constant 0 : index
    %c0_34 = arith.constant 0 : index
    %50 = vector.load %arg8[%c0_32, %c0_33, %c0_34] : memref<4x8x1xf32, #tpu.memory_space<vmem>>, vector<1x8x1xf32>
    %51 = vector.shape_cast %50 : vector<1x8x1xf32> to vector<8x1xf32>
    %52 = vector.shape_cast %25 : vector<8x1xf32> to vector<1x8x1xf32>
    tpu.vector_store %arg8[%c0_32, %c0_33, %c0_34], %52 {strides = array<i32>} : memref<4x8x1xf32, #tpu.memory_space<vmem>>, vector<1x8x1xf32>,
    %53 = vector.extract_strided_slice %10 {offsets = [0, 8], sizes = [8, 8], strides = [1, 1]} : vector<8x32xbf16> to vector<8x8xbf16>
    %54 = vector.extract_strided_slice %12 {offsets = [0, 8], sizes = [8, 8], strides = [1, 1]} : vector<8x32xbf16> to vector<8x8xbf16>
    %55 = vector.extract_strided_slice %14 {offsets = [0, 8], sizes = [8, 8], strides = [1, 1]} : vector<8x32xbf16> to vector<8x8xbf16>
    %cst_35 = arith.constant dense<0.000000e+00> : vector<8x8xf32>
    %56 = tpu.matmul %53, %54, %cst_35 {dimension_numbers = #tpu.dot_dimension_numbers<[1], [1], [0], [0], [0, 0, 1, 0], [], []>} : vector<8x8xbf16>, vector<8x8xbf16>, vector<8x8xf32> -> vector<8x8xf32>
    %57 = vector.broadcast %8 : vector<1x8xf32> to vector<8x8xf32>
    %58 = arith.addf %56, %57 : vector<8x8xf32>
    %c1 = arith.constant 1 : index
    %c0_36 = arith.constant 0 : index
    %c0_37 = arith.constant 0 : index
    %59 = vector.load %arg8[%c1, %c0_36, %c0_37] : memref<4x8x1xf32, #tpu.memory_space<vmem>>, vector<1x8x1xf32>
    %60 = vector.shape_cast %59 : vector<1x8x1xf32> to vector<8x1xf32>
    %cst_38 = arith.constant dense<0xFF800000> : vector<8xf32>
    %61 = vector.multi_reduction <maximumf>, %58, %cst_38 [1] : vector<8x8xf32> to vector<8xf32>
    %62 = vector.shape_cast %61 : vector<8xf32> to vector<8x1xf32>
    %63 = arith.maximumf %60, %62 : vector<8x1xf32>
    %64 = arith.subf %60, %63 : vector<8x1xf32>
    %65 = math.exp %64 : vector<8x1xf32>
    %66 = vector.broadcast %63 : vector<8x1xf32> to vector<8x8xf32>
    %67 = arith.subf %58, %66 : vector<8x8xf32>
    %68 = math.exp %67 : vector<8x8xf32>
    %c1_39 = arith.constant 1 : index
    %c0_40 = arith.constant 0 : index
    %c0_41 = arith.constant 0 : index
    %69 = vector.load %arg9[%c1_39, %c0_40, %c0_41] : memref<4x8x1xf32, #tpu.memory_space<vmem>>, vector<1x8x1xf32>
    %70 = vector.shape_cast %69 : vector<1x8x1xf32> to vector<8x1xf32>
    %71 = arith.mulf %65, %70 : vector<8x1xf32>
    %cst_42 = arith.constant dense<0.000000e+00> : vector<8xf32>
    %72 = vector.multi_reduction <add>, %68, %cst_42 [1] : vector<8x8xf32> to vector<8xf32>
    %73 = vector.shape_cast %72 : vector<8xf32> to vector<8x1xf32>
    %74 = arith.addf %71, %73 : vector<8x1xf32>
    %c1_43 = arith.constant 1 : index
    %c0_44 = arith.constant 0 : index
    %c0_45 = arith.constant 0 : index
    %75 = vector.load %arg9[%c1_43, %c0_44, %c0_45] : memref<4x8x1xf32, #tpu.memory_space<vmem>>, vector<1x8x1xf32>
    %76 = vector.shape_cast %75 : vector<1x8x1xf32> to vector<8x1xf32>
    %77 = vector.shape_cast %74 : vector<8x1xf32> to vector<1x8x1xf32>
    tpu.vector_store %arg9[%c1_43, %c0_44, %c0_45], %77 {strides = array<i32>} : memref<4x8x1xf32, #tpu.memory_space<vmem>>, vector<1x8x1xf32>,
    %c1_46 = arith.constant 1 : index
    %c0_47 = arith.constant 0 : index
    %c0_48 = arith.constant 0 : index
    %78 = vector.load %arg10[%c1_46, %c0_47, %c0_48] : memref<4x8x8xf32, #tpu.memory_space<vmem>>, vector<1x8x8xf32>
    %79 = vector.shape_cast %78 : vector<1x8x8xf32> to vector<8x8xf32>
    %80 = vector.broadcast %65 : vector<8x1xf32> to vector<8x8xf32>
    %81 = arith.mulf %80, %79 : vector<8x8xf32>
    %82 = arith.truncf %68 : vector<8x8xf32> to vector<8x8xbf16>
    %cst_49 = arith.constant dense<0.000000e+00> : vector<8x8xf32>
    %83 = tpu.matmul %82, %55, %cst_49 {dimension_numbers = #tpu.dot_dimension_numbers<[1], [0], [0], [1], [0, 0, 1, 1], [], []>} : vector<8x8xbf16>, vector<8x8xbf16>, vector<8x8xf32> -> vector<8x8xf32>
    %84 = arith.addf %81, %83 : vector<8x8xf32>
    %c1_50 = arith.constant 1 : index
    %c0_51 = arith.constant 0 : index
    %c0_52 = arith.constant 0 : index
    %85 = vector.load %arg10[%c1_50, %c0_51, %c0_52] : memref<4x8x8xf32, #tpu.memory_space<vmem>>, vector<1x8x8xf32>
    %86 = vector.shape_cast %85 : vector<1x8x8xf32> to vector<8x8xf32>
    %87 = vector.shape_cast %84 : vector<8x8xf32> to vector<1x8x8xf32>
    tpu.vector_store %arg10[%c1_50, %c0_51, %c0_52], %87 {strides = array<i32>} : memref<4x8x8xf32, #tpu.memory_space<vmem>>, vector<1x8x8xf32>,
    %c1_53 = arith.constant 1 : index
    %c0_54 = arith.constant 0 : index
    %c0_55 = arith.constant 0 : index
    %88 = vector.load %arg8[%c1_53, %c0_54, %c0_55] : memref<4x8x1xf32, #tpu.memory_space<vmem>>, vector<1x8x1xf32>
    %89 = vector.shape_cast %88 : vector<1x8x1xf32> to vector<8x1xf32>
    %90 = vector.shape_cast %63 : vector<8x1xf32> to vector<1x8x1xf32>
    tpu.vector_store %arg8[%c1_53, %c0_54, %c0_55], %90 {strides = array<i32>} : memref<4x8x1xf32, #tpu.memory_space<vmem>>, vector<1x8x1xf32>,
    %91 = vector.extract_strided_slice %10 {offsets = [0, 16], sizes = [8, 8], strides = [1, 1]} : vector<8x32xbf16> to vector<8x8xbf16>
    %92 = vector.extract_strided_slice %12 {offsets = [0, 16], sizes = [8, 8], strides = [1, 1]} : vector<8x32xbf16> to vector<8x8xbf16>
    %93 = vector.extract_strided_slice %14 {offsets = [0, 16], sizes = [8, 8], strides = [1, 1]} : vector<8x32xbf16> to vector<8x8xbf16>
    %cst_56 = arith.constant dense<0.000000e+00> : vector<8x8xf32>
    %94 = tpu.matmul %91, %92, %cst_56 {dimension_numbers = #tpu.dot_dimension_numbers<[1], [1], [0], [0], [0, 0, 1, 0], [], []>} : vector<8x8xbf16>, vector<8x8xbf16>, vector<8x8xf32> -> vector<8x8xf32>
    %95 = vector.broadcast %8 : vector<1x8xf32> to vector<8x8xf32>
    %96 = arith.addf %94, %95 : vector<8x8xf32>
    %c2 = arith.constant 2 : index
    %c0_57 = arith.constant 0 : index
    %c0_58 = arith.constant 0 : index
    %97 = vector.load %arg8[%c2, %c0_57, %c0_58] : memref<4x8x1xf32, #tpu.memory_space<vmem>>, vector<1x8x1xf32>
    %98 = vector.shape_cast %97 : vector<1x8x1xf32> to vector<8x1xf32>
    %cst_59 = arith.constant dense<0xFF800000> : vector<8xf32>
    %99 = vector.multi_reduction <maximumf>, %96, %cst_59 [1] : vector<8x8xf32> to vector<8xf32>
    %100 = vector.shape_cast %99 : vector<8xf32> to vector<8x1xf32>
    %101 = arith.maximumf %98, %100 : vector<8x1xf32>
    %102 = arith.subf %98, %101 : vector<8x1xf32>
    %103 = math.exp %102 : vector<8x1xf32>
    %104 = vector.broadcast %101 : vector<8x1xf32> to vector<8x8xf32>
    %105 = arith.subf %96, %104 : vector<8x8xf32>
    %106 = math.exp %105 : vector<8x8xf32>
    %c2_60 = arith.constant 2 : index
    %c0_61 = arith.constant 0 : index
    %c0_62 = arith.constant 0 : index
    %107 = vector.load %arg9[%c2_60, %c0_61, %c0_62] : memref<4x8x1xf32, #tpu.memory_space<vmem>>, vector<1x8x1xf32>
    %108 = vector.shape_cast %107 : vector<1x8x1xf32> to vector<8x1xf32>
    %109 = arith.mulf %103, %108 : vector<8x1xf32>
    %cst_63 = arith.constant dense<0.000000e+00> : vector<8xf32>
    %110 = vector.multi_reduction <add>, %106, %cst_63 [1] : vector<8x8xf32> to vector<8xf32>
    %111 = vector.shape_cast %110 : vector<8xf32> to vector<8x1xf32>
    %112 = arith.addf %109, %111 : vector<8x1xf32>
    %c2_64 = arith.constant 2 : index
    %c0_65 = arith.constant 0 : index
    %c0_66 = arith.constant 0 : index
    %113 = vector.load %arg9[%c2_64, %c0_65, %c0_66] : memref<4x8x1xf32, #tpu.memory_space<vmem>>, vector<1x8x1xf32>
    %114 = vector.shape_cast %113 : vector<1x8x1xf32> to vector<8x1xf32>
    %115 = vector.shape_cast %112 : vector<8x1xf32> to vector<1x8x1xf32>
    tpu.vector_store %arg9[%c2_64, %c0_65, %c0_66], %115 {strides = array<i32>} : memref<4x8x1xf32, #tpu.memory_space<vmem>>, vector<1x8x1xf32>,
    %c2_67 = arith.constant 2 : index
    %c0_68 = arith.constant 0 : index
    %c0_69 = arith.constant 0 : index
    %116 = vector.load %arg10[%c2_67, %c0_68, %c0_69] : memref<4x8x8xf32, #tpu.memory_space<vmem>>, vector<1x8x8xf32>
    %117 = vector.shape_cast %116 : vector<1x8x8xf32> to vector<8x8xf32>
    %118 = vector.broadcast %103 : vector<8x1xf32> to vector<8x8xf32>
    %119 = arith.mulf %118, %117 : vector<8x8xf32>
    %120 = arith.truncf %106 : vector<8x8xf32> to vector<8x8xbf16>
    %cst_70 = arith.constant dense<0.000000e+00> : vector<8x8xf32>
    %121 = tpu.matmul %120, %93, %cst_70 {dimension_numbers = #tpu.dot_dimension_numbers<[1], [0], [0], [1], [0, 0, 1, 1], [], []>} : vector<8x8xbf16>, vector<8x8xbf16>, vector<8x8xf32> -> vector<8x8xf32>
    %122 = arith.addf %119, %121 : vector<8x8xf32>
    %c2_71 = arith.constant 2 : index
    %c0_72 = arith.constant 0 : index
    %c0_73 = arith.constant 0 : index
    %123 = vector.load %arg10[%c2_71, %c0_72, %c0_73] : memref<4x8x8xf32, #tpu.memory_space<vmem>>, vector<1x8x8xf32>
    %124 = vector.shape_cast %123 : vector<1x8x8xf32> to vector<8x8xf32>
    %125 = vector.shape_cast %122 : vector<8x8xf32> to vector<1x8x8xf32>
    tpu.vector_store %arg10[%c2_71, %c0_72, %c0_73], %125 {strides = array<i32>} : memref<4x8x8xf32, #tpu.memory_space<vmem>>, vector<1x8x8xf32>,
    %c2_74 = arith.constant 2 : index
    %c0_75 = arith.constant 0 : index
    %c0_76 = arith.constant 0 : index
    %126 = vector.load %arg8[%c2_74, %c0_75, %c0_76] : memref<4x8x1xf32, #tpu.memory_space<vmem>>, vector<1x8x1xf32>
    %127 = vector.shape_cast %126 : vector<1x8x1xf32> to vector<8x1xf32>
    %128 = vector.shape_cast %101 : vector<8x1xf32> to vector<1x8x1xf32>
    tpu.vector_store %arg8[%c2_74, %c0_75, %c0_76], %128 {strides = array<i32>} : memref<4x8x1xf32, #tpu.memory_space<vmem>>, vector<1x8x1xf32>,
    %129 = vector.extract_strided_slice %10 {offsets = [0, 24], sizes = [8, 8], strides = [1, 1]} : vector<8x32xbf16> to vector<8x8xbf16>
    %130 = vector.extract_strided_slice %12 {offsets = [0, 24], sizes = [8, 8], strides = [1, 1]} : vector<8x32xbf16> to vector<8x8xbf16>
    %131 = vector.extract_strided_slice %14 {offsets = [0, 24], sizes = [8, 8], strides = [1, 1]} : vector<8x32xbf16> to vector<8x8xbf16>
    %cst_77 = arith.constant dense<0.000000e+00> : vector<8x8xf32>
    %132 = tpu.matmul %129, %130, %cst_77 {dimension_numbers = #tpu.dot_dimension_numbers<[1], [1], [0], [0], [0, 0, 1, 0], [], []>} : vector<8x8xbf16>, vector<8x8xbf16>, vector<8x8xf32> -> vector<8x8xf32>
    %133 = vector.broadcast %8 : vector<1x8xf32> to vector<8x8xf32>
    %134 = arith.addf %132, %133 : vector<8x8xf32>
    %c3 = arith.constant 3 : index
    %c0_78 = arith.constant 0 : index
    %c0_79 = arith.constant 0 : index
    %135 = vector.load %arg8[%c3, %c0_78, %c0_79] : memref<4x8x1xf32, #tpu.memory_space<vmem>>, vector<1x8x1xf32>
    %136 = vector.shape_cast %135 : vector<1x8x1xf32> to vector<8x1xf32>
    %cst_80 = arith.constant dense<0xFF800000> : vector<8xf32>
    %137 = vector.multi_reduction <maximumf>, %134, %cst_80 [1] : vector<8x8xf32> to vector<8xf32>
    %138 = vector.shape_cast %137 : vector<8xf32> to vector<8x1xf32>
    %139 = arith.maximumf %136, %138 : vector<8x1xf32>
    %140 = arith.subf %136, %139 : vector<8x1xf32>
    %141 = math.exp %140 : vector<8x1xf32>
    %142 = vector.broadcast %139 : vector<8x1xf32> to vector<8x8xf32>
    %143 = arith.subf %134, %142 : vector<8x8xf32>
    %144 = math.exp %143 : vector<8x8xf32>
    %c3_81 = arith.constant 3 : index
    %c0_82 = arith.constant 0 : index
    %c0_83 = arith.constant 0 : index
    %145 = vector.load %arg9[%c3_81, %c0_82, %c0_83] : memref<4x8x1xf32, #tpu.memory_space<vmem>>, vector<1x8x1xf32>
    %146 = vector.shape_cast %145 : vector<1x8x1xf32> to vector<8x1xf32>
    %147 = arith.mulf %141, %146 : vector<8x1xf32>
    %cst_84 = arith.constant dense<0.000000e+00> : vector<8xf32>
    %148 = vector.multi_reduction <add>, %144, %cst_84 [1] : vector<8x8xf32> to vector<8xf32>
    %149 = vector.shape_cast %148 : vector<8xf32> to vector<8x1xf32>
    %150 = arith.addf %147, %149 : vector<8x1xf32>
    %c3_85 = arith.constant 3 : index
    %c0_86 = arith.constant 0 : index
    %c0_87 = arith.constant 0 : index
    %151 = vector.load %arg9[%c3_85, %c0_86, %c0_87] : memref<4x8x1xf32, #tpu.memory_space<vmem>>, vector<1x8x1xf32>
    %152 = vector.shape_cast %151 : vector<1x8x1xf32> to vector<8x1xf32>
    %153 = vector.shape_cast %150 : vector<8x1xf32> to vector<1x8x1xf32>
    tpu.vector_store %arg9[%c3_85, %c0_86, %c0_87], %153 {strides = array<i32>} : memref<4x8x1xf32, #tpu.memory_space<vmem>>, vector<1x8x1xf32>,
    %c3_88 = arith.constant 3 : index
    %c0_89 = arith.constant 0 : index
    %c0_90 = arith.constant 0 : index
    %154 = vector.load %arg10[%c3_88, %c0_89, %c0_90] : memref<4x8x8xf32, #tpu.memory_space<vmem>>, vector<1x8x8xf32>
    %155 = vector.shape_cast %154 : vector<1x8x8xf32> to vector<8x8xf32>
    %156 = vector.broadcast %141 : vector<8x1xf32> to vector<8x8xf32>
    %157 = arith.mulf %156, %155 : vector<8x8xf32>
    %158 = arith.truncf %144 : vector<8x8xf32> to vector<8x8xbf16>
    %cst_91 = arith.constant dense<0.000000e+00> : vector<8x8xf32>
    %159 = tpu.matmul %158, %131, %cst_91 {dimension_numbers = #tpu.dot_dimension_numbers<[1], [0], [0], [1], [0, 0, 1, 1], [], []>} : vector<8x8xbf16>, vector<8x8xbf16>, vector<8x8xf32> -> vector<8x8xf32>
    %160 = arith.addf %157, %159 : vector<8x8xf32>
    %c3_92 = arith.constant 3 : index
    %c0_93 = arith.constant 0 : index
    %c0_94 = arith.constant 0 : index
    %161 = vector.load %arg10[%c3_92, %c0_93, %c0_94] : memref<4x8x8xf32, #tpu.memory_space<vmem>>, vector<1x8x8xf32>
    %162 = vector.shape_cast %161 : vector<1x8x8xf32> to vector<8x8xf32>
    %163 = vector.shape_cast %160 : vector<8x8xf32> to vector<1x8x8xf32>
    tpu.vector_store %arg10[%c3_92, %c0_93, %c0_94], %163 {strides = array<i32>} : memref<4x8x8xf32, #tpu.memory_space<vmem>>, vector<1x8x8xf32>,
    %c3_95 = arith.constant 3 : index
    %c0_96 = arith.constant 0 : index
    %c0_97 = arith.constant 0 : index
    %164 = vector.load %arg8[%c3_95, %c0_96, %c0_97] : memref<4x8x1xf32, #tpu.memory_space<vmem>>, vector<1x8x1xf32>
    %165 = vector.shape_cast %164 : vector<1x8x1xf32> to vector<8x1xf32>
    %166 = vector.shape_cast %139 : vector<8x1xf32> to vector<1x8x1xf32>
    tpu.vector_store %arg8[%c3_95, %c0_96, %c0_97], %166 {strides = array<i32>} : memref<4x8x1xf32, #tpu.memory_space<vmem>>, vector<1x8x1xf32>,
    %c0_i32_98 = arith.constant 0 : i32
    %167 = arith.cmpi eq, %arg2, %c0_i32_98 : i32
    %168 = arith.extui %167 : i1 to i32
    %c0_i32_99 = arith.constant 0 : i32
    %169 = arith.cmpi ne, %168, %c0_i32_99 : i32
    scf.if %169 {
      %c0_100 = arith.constant 0 : index
      %c0_101 = arith.constant 0 : index
      %c0_102 = arith.constant 0 : index
      %170 = vector.load %arg10[%c0_100, %c0_101, %c0_102] : memref<4x8x8xf32, #tpu.memory_space<vmem>>, vector<1x8x8xf32>
      %171 = vector.shape_cast %170 : vector<1x8x8xf32> to vector<8x8xf32>
      %c0_103 = arith.constant 0 : index
      %c0_104 = arith.constant 0 : index
      %c0_105 = arith.constant 0 : index
      %172 = vector.load %arg9[%c0_103, %c0_104, %c0_105] : memref<4x8x1xf32, #tpu.memory_space<vmem>>, vector<1x8x1xf32>
      %173 = vector.shape_cast %172 : vector<1x8x1xf32> to vector<8x1xf32>
      %174 = tpu.reciprocal %173 {approx = true} : vector<8x1xf32> -> vector<8x1xf32>
      %175 = vector.broadcast %174 : vector<8x1xf32> to vector<8x8xf32>
      %176 = arith.mulf %171, %175 : vector<8x8xf32>
      %c1_106 = arith.constant 1 : index
      %c0_107 = arith.constant 0 : index
      %c0_108 = arith.constant 0 : index
      %177 = vector.load %arg10[%c1_106, %c0_107, %c0_108] : memref<4x8x8xf32, #tpu.memory_space<vmem>>, vector<1x8x8xf32>
      %178 = vector.shape_cast %177 : vector<1x8x8xf32> to vector<8x8xf32>
      %c1_109 = arith.constant 1 : index
      %c0_110 = arith.constant 0 : index
      %c0_111 = arith.constant 0 : index
      %179 = vector.load %arg9[%c1_109, %c0_110, %c0_111] : memref<4x8x1xf32, #tpu.memory_space<vmem>>, vector<1x8x1xf32>
      %180 = vector.shape_cast %179 : vector<1x8x1xf32> to vector<8x1xf32>
      %181 = tpu.reciprocal %180 {approx = true} : vector<8x1xf32> -> vector<8x1xf32>
      %182 = vector.broadcast %181 : vector<8x1xf32> to vector<8x8xf32>
      %183 = arith.mulf %178, %182 : vector<8x8xf32>
      %c2_112 = arith.constant 2 : index
      %c0_113 = arith.constant 0 : index
      %c0_114 = arith.constant 0 : index
      %184 = vector.load %arg10[%c2_112, %c0_113, %c0_114] : memref<4x8x8xf32, #tpu.memory_space<vmem>>, vector<1x8x8xf32>
      %185 = vector.shape_cast %184 : vector<1x8x8xf32> to vector<8x8xf32>
      %c2_115 = arith.constant 2 : index
      %c0_116 = arith.constant 0 : index
      %c0_117 = arith.constant 0 : index
      %186 = vector.load %arg9[%c2_115, %c0_116, %c0_117] : memref<4x8x1xf32, #tpu.memory_space<vmem>>, vector<1x8x1xf32>
      %187 = vector.shape_cast %186 : vector<1x8x1xf32> to vector<8x1xf32>
      %188 = tpu.reciprocal %187 {approx = true} : vector<8x1xf32> -> vector<8x1xf32>
      %189 = vector.broadcast %188 : vector<8x1xf32> to vector<8x8xf32>
      %190 = arith.mulf %185, %189 : vector<8x8xf32>
      %c3_118 = arith.constant 3 : index
      %c0_119 = arith.constant 0 : index
      %c0_120 = arith.constant 0 : index
      %191 = vector.load %arg10[%c3_118, %c0_119, %c0_120] : memref<4x8x8xf32, #tpu.memory_space<vmem>>, vector<1x8x8xf32>
      %192 = vector.shape_cast %191 : vector<1x8x8xf32> to vector<8x8xf32>
      %c3_121 = arith.constant 3 : index
      %c0_122 = arith.constant 0 : index
      %c0_123 = arith.constant 0 : index
      %193 = vector.load %arg9[%c3_121, %c0_122, %c0_123] : memref<4x8x1xf32, #tpu.memory_space<vmem>>, vector<1x8x1xf32>
      %194 = vector.shape_cast %193 : vector<1x8x1xf32> to vector<8x1xf32>
      %195 = tpu.reciprocal %194 {approx = true} : vector<8x1xf32> -> vector<8x1xf32>
      %196 = vector.broadcast %195 : vector<8x1xf32> to vector<8x8xf32>
      %197 = arith.mulf %192, %196 : vector<8x8xf32>
      %198 = tpu.concatenate %176, %183, %190, %197 in 1 : vector<8x8xf32>, vector<8x8xf32>, vector<8x8xf32>, vector<8x8xf32> -> vector<8x32xf32>
      %199 = arith.truncf %198 : vector<8x32xf32> to vector<8x32xbf16>
      %c0_124 = arith.constant 0 : index
      %c0_125 = arith.constant 0 : index
      %c0_126 = arith.constant 0 : index
      %200 = vector.load %arg7[%c0_124, %c0_125, %c0_126] : memref<1x8x32xbf16, #tpu.memory_space<vmem>>, vector<1x8x32xbf16>
      %201 = vector.shape_cast %200 : vector<1x8x32xbf16> to vector<8x32xbf16>
      %202 = vector.shape_cast %199 : vector<8x32xbf16> to vector<1x8x32xbf16>
      tpu.vector_store %arg7[%c0_124, %c0_125, %c0_126], %202 {strides = array<i32>} : memref<1x8x32xbf16, #tpu.memory_space<vmem>>, vector<1x8x32xbf16>,
    } else {
    }
    return
  }
  func.func @transform_0(%arg0: i32, %arg1: i32, %arg2: i32) -> (i32, i32, i32) {
    %c0_i32 = arith.constant 0 : i32
    %c0_i32_0 = arith.constant 0 : i32
    return %arg0, %c0_i32, %arg1 : i32, i32, i32
  }
  func.func @transform_1(%arg0: i32, %arg1: i32, %arg2: i32) -> (i32, i32, i32) {
    %c0_i32 = arith.constant 0 : i32
    return %arg0, %arg2, %arg1 : i32, i32, i32
  }
  func.func @transform_2(%arg0: i32, %arg1: i32, %arg2: i32) -> (i32, i32, i32) {
    %c0_i32 = arith.constant 0 : i32
    return %arg0, %arg2, %arg1 : i32, i32, i32
  }
  func.func @transform_3(%arg0: i32, %arg1: i32, %arg2: i32) -> (i32, i32, i32) {
    %c0_i32 = arith.constant 0 : i32
    %c0_i32_0 = arith.constant 0 : i32
    return %arg0, %c0_i32, %arg2 : i32, i32, i32
  }
  func.func @transform_4(%arg0: i32, %arg1: i32, %arg2: i32) -> (i32, i32, i32) {
    %c0_i32 = arith.constant 0 : i32
    %c0_i32_0 = arith.constant 0 : i32
    return %arg0, %c0_i32, %arg1 : i32, i32, i32
  }
}

module attributes {stable_mosaic.version = 11 : i64} {
  func.func @kernel(%arg0: i32, %arg1: i32, %arg2: memref<8x64xbf16, #tpu.memory_space<vmem>>, %arg3: memref<64x32xbf16, #tpu.memory_space<vmem>>, %arg4: memref<1x32xf32, #tpu.memory_space<vmem>>, %arg5: memref<8x32xbf16, #tpu.memory_space<vmem>>, %arg6: memref<1x32xf32, #tpu.memory_space<vmem>>, %arg7: memref<1x32xf32, #tpu.memory_space<vmem>>, %arg8: memref<8x32xbf16, #tpu.memory_space<vmem>>, %arg9: memref<8x32xf32, #tpu.memory_space<vmem>>) attributes {dimension_semantics = [#tpu.dimension_semantics<parallel>, #tpu.dimension_semantics<arbitrary>], iteration_bounds = array<i64: 2, 1>, scalar_prefetch = 0 : i64, scratch_operands = 1 : i64, tpu.core_type = #tpu.core_type<tc>, window_params = [{transform_indices = @transform_0, window_bounds = array<i64: 8, 64>}, {transform_indices = @transform_1, window_bounds = array<i64: 64, 32>}, {pipeline_mode = #tpu.pipeline_mode<synchronous>, transform_indices = @transform_2, window_bounds = array<i64: 1, 32>}, {transform_indices = @transform_3, window_bounds = array<i64: 8, 32>}, {pipeline_mode = #tpu.pipeline_mode<synchronous>, transform_indices = @transform_4, window_bounds = array<i64: 1, 32>}, {pipeline_mode = #tpu.pipeline_mode<synchronous>, transform_indices = @transform_5, window_bounds = array<i64: 1, 32>}, {transform_indices = @transform_6, window_bounds = array<i64: 8, 32>}]} {
    %c0_i32 = arith.constant 0 : i32
    %0 = arith.cmpi eq, %arg1, %c0_i32 : i32
    %1 = arith.extui %0 : i1 to i32
    %c0_i32_0 = arith.constant 0 : i32
    %2 = arith.cmpi ne, %1, %c0_i32_0 : i32
    scf.if %2 {
      %cst_10 = arith.constant 0.000000e+00 : f32
      %12 = vector.broadcast %cst_10 : f32 to vector<8x32xf32>
      %c0_11 = arith.constant 0 : index
      %c0_12 = arith.constant 0 : index
      %13 = vector.load %arg9[%c0_11, %c0_12] : memref<8x32xf32, #tpu.memory_space<vmem>>, vector<8x32xf32>
      tpu.vector_store %arg9[%c0_11, %c0_12], %12 {strides = array<i32>} : memref<8x32xf32, #tpu.memory_space<vmem>>, vector<8x32xf32>,
    } else {
    }
    %c0 = arith.constant 0 : index
    %c0_1 = arith.constant 0 : index
    %3 = vector.load %arg9[%c0, %c0_1] : memref<8x32xf32, #tpu.memory_space<vmem>>, vector<8x32xf32>
    %c0_2 = arith.constant 0 : index
    %c0_3 = arith.constant 0 : index
    %4 = vector.load %arg2[%c0_2, %c0_3] : memref<8x64xbf16, #tpu.memory_space<vmem>>, vector<8x64xbf16>
    %c0_4 = arith.constant 0 : index
    %c0_5 = arith.constant 0 : index
    %5 = vector.load %arg3[%c0_4, %c0_5] : memref<64x32xbf16, #tpu.memory_space<vmem>>, vector<64x32xbf16>
    %cst = arith.constant dense<0.000000e+00> : vector<8x32xf32>
    %6 = tpu.matmul %4, %5, %cst {dimension_numbers = #tpu.dot_dimension_numbers<[1], [0], [0], [1], [0, 0, 1, 1], [], []>} : vector<8x64xbf16>, vector<64x32xbf16>, vector<8x32xf32> -> vector<8x32xf32>
    %7 = arith.addf %3, %6 : vector<8x32xf32>
    %c0_6 = arith.constant 0 : index
    %c0_7 = arith.constant 0 : index
    %8 = vector.load %arg9[%c0_6, %c0_7] : memref<8x32xf32, #tpu.memory_space<vmem>>, vector<8x32xf32>
    tpu.vector_store %arg9[%c0_6, %c0_7], %7 {strides = array<i32>} : memref<8x32xf32, #tpu.memory_space<vmem>>, vector<8x32xf32>,
    %c0_i32_8 = arith.constant 0 : i32
    %9 = arith.cmpi eq, %arg1, %c0_i32_8 : i32
    %10 = arith.extui %9 : i1 to i32
    %c0_i32_9 = arith.constant 0 : i32
    %11 = arith.cmpi ne, %10, %c0_i32_9 : i32
    scf.if %11 {
      %c0_10 = arith.constant 0 : index
      %c0_11 = arith.constant 0 : index
      %12 = vector.load %arg9[%c0_10, %c0_11] : memref<8x32xf32, #tpu.memory_space<vmem>>, vector<8x32xf32>
      %c0_12 = arith.constant 0 : index
      %c0_13 = arith.constant 0 : index
      %13 = vector.load %arg4[%c0_12, %c0_13] : memref<1x32xf32, #tpu.memory_space<vmem>>, vector<1x32xf32>
      %14 = vector.broadcast %13 : vector<1x32xf32> to vector<8x32xf32>
      %15 = arith.addf %12, %14 : vector<8x32xf32>
      %c0_14 = arith.constant 0 : index
      %c0_15 = arith.constant 0 : index
      %16 = vector.load %arg5[%c0_14, %c0_15] : memref<8x32xbf16, #tpu.memory_space<vmem>>, vector<8x32xbf16>
      %17 = arith.extf %16 : vector<8x32xbf16> to vector<8x32xf32>
      %18 = arith.addf %15, %17 : vector<8x32xf32>
      %cst_16 = arith.constant dense<0.000000e+00> : vector<8xf32>
      %19 = vector.multi_reduction <add>, %18, %cst_16 [1] : vector<8x32xf32> to vector<8xf32>
      %20 = vector.shape_cast %19 : vector<8xf32> to vector<8x1xf32>
      %cst_17 = arith.constant 3.200000e+01 : f32
      %21 = vector.broadcast %cst_17 : f32 to vector<8x1xf32>
      %22 = arith.divf %20, %21 : vector<8x1xf32>
      %23 = vector.broadcast %22 : vector<8x1xf32> to vector<8x32xf32>
      %24 = arith.subf %18, %23 : vector<8x32xf32>
      %25 = arith.mulf %24, %24 : vector<8x32xf32>
      %cst_18 = arith.constant dense<0.000000e+00> : vector<8xf32>
      %26 = vector.multi_reduction <add>, %25, %cst_18 [1] : vector<8x32xf32> to vector<8xf32>
      %27 = vector.shape_cast %26 : vector<8xf32> to vector<8x1xf32>
      %cst_19 = arith.constant 3.200000e+01 : f32
      %28 = vector.broadcast %cst_19 : f32 to vector<8x1xf32>
      %29 = arith.divf %27, %28 : vector<8x1xf32>
      %30 = vector.broadcast %22 : vector<8x1xf32> to vector<8x32xf32>
      %31 = arith.subf %18, %30 : vector<8x32xf32>
      %cst_20 = arith.constant 9.99999996E-13 : f32
      %32 = vector.broadcast %cst_20 : f32 to vector<8x1xf32>
      %33 = arith.addf %29, %32 : vector<8x1xf32>
      %34 = math.rsqrt %33 : vector<8x1xf32>
      %35 = vector.broadcast %34 : vector<8x1xf32> to vector<8x32xf32>
      %36 = arith.mulf %31, %35 : vector<8x32xf32>
      %c0_21 = arith.constant 0 : index
      %c0_22 = arith.constant 0 : index
      %37 = vector.load %arg6[%c0_21, %c0_22] : memref<1x32xf32, #tpu.memory_space<vmem>>, vector<1x32xf32>
      %38 = vector.broadcast %37 : vector<1x32xf32> to vector<8x32xf32>
      %39 = arith.mulf %36, %38 : vector<8x32xf32>
      %c0_23 = arith.constant 0 : index
      %c0_24 = arith.constant 0 : index
      %40 = vector.load %arg7[%c0_23, %c0_24] : memref<1x32xf32, #tpu.memory_space<vmem>>, vector<1x32xf32>
      %41 = vector.broadcast %40 : vector<1x32xf32> to vector<8x32xf32>
      %42 = arith.addf %39, %41 : vector<8x32xf32>
      %43 = arith.truncf %42 : vector<8x32xf32> to vector<8x32xbf16>
      %c0_25 = arith.constant 0 : index
      %c0_26 = arith.constant 0 : index
      %44 = vector.load %arg8[%c0_25, %c0_26] : memref<8x32xbf16, #tpu.memory_space<vmem>>, vector<8x32xbf16>
      tpu.vector_store %arg8[%c0_25, %c0_26], %43 {strides = array<i32>} : memref<8x32xbf16, #tpu.memory_space<vmem>>, vector<8x32xbf16>,
    } else {
    }
    return
  }
  func.func @transform_0(%arg0: i32, %arg1: i32) -> (i32, i32) {
    %c0_i32 = arith.constant 0 : i32
    return %arg0, %arg1 : i32, i32
  }
  func.func @transform_1(%arg0: i32, %arg1: i32) -> (i32, i32) {
    %c0_i32 = arith.constant 0 : i32
    %c0_i32_0 = arith.constant 0 : i32
    return %arg1, %c0_i32 : i32, i32
  }
  func.func @transform_2(%arg0: i32, %arg1: i32) -> (i32, i32) {
    %c0_i32 = arith.constant 0 : i32
    %c0_i32_0 = arith.constant 0 : i32
    %c0_i32_1 = arith.constant 0 : i32
    return %c0_i32, %c0_i32_0 : i32, i32
  }
  func.func @transform_3(%arg0: i32, %arg1: i32) -> (i32, i32) {
    %c0_i32 = arith.constant 0 : i32
    %c0_i32_0 = arith.constant 0 : i32
    return %arg0, %c0_i32 : i32, i32
  }
  func.func @transform_4(%arg0: i32, %arg1: i32) -> (i32, i32) {
    %c0_i32 = arith.constant 0 : i32
    %c0_i32_0 = arith.constant 0 : i32
    %c0_i32_1 = arith.constant 0 : i32
    return %c0_i32, %c0_i32_0 : i32, i32
  }
  func.func @transform_5(%arg0: i32, %arg1: i32) -> (i32, i32) {
    %c0_i32 = arith.constant 0 : i32
    %c0_i32_0 = arith.constant 0 : i32
    %c0_i32_1 = arith.constant 0 : i32
    return %c0_i32, %c0_i32_0 : i32, i32
  }
  func.func @transform_6(%arg0: i32, %arg1: i32) -> (i32, i32) {
    %c0_i32 = arith.constant 0 : i32
    %c0_i32_0 = arith.constant 0 : i32
    return %arg0, %c0_i32 : i32, i32
  }
}

module attributes {stable_mosaic.version = 11 : i64} {
  func.func @kernel(%arg0: i32, %arg1: i32, %arg2: i32, %arg3: memref<8x32xbf16, #tpu.memory_space<vmem>>, %arg4: memref<32x64xbf16, #tpu.memory_space<vmem>>, %arg5: memref<1x64xf32, #tpu.memory_space<vmem>>, %arg6: memref<8x64xbf16, #tpu.memory_space<vmem>>, %arg7: memref<8x64xf32, #tpu.memory_space<vmem>>) attributes {dimension_semantics = [#tpu.dimension_semantics<parallel>, #tpu.dimension_semantics<parallel>, #tpu.dimension_semantics<arbitrary>], iteration_bounds = array<i64: 2, 1, 1>, scalar_prefetch = 0 : i64, scratch_operands = 1 : i64, tpu.core_type = #tpu.core_type<tc>, window_params = [{transform_indices = @transform_0, window_bounds = array<i64: 8, 32>}, {transform_indices = @transform_1, window_bounds = array<i64: 32, 64>}, {transform_indices = @transform_2, window_bounds = array<i64: 1, 64>}, {transform_indices = @transform_3, window_bounds = array<i64: 8, 64>}]} {
    %c0_i32 = arith.constant 0 : i32
    %0 = arith.cmpi eq, %arg2, %c0_i32 : i32
    %1 = arith.extui %0 : i1 to i32
    %c0_i32_0 = arith.constant 0 : i32
    %2 = arith.cmpi ne, %1, %c0_i32_0 : i32
    scf.if %2 {
      %cst_10 = arith.constant 0.000000e+00 : f32
      %12 = vector.broadcast %cst_10 : f32 to vector<8x64xf32>
      %c0_11 = arith.constant 0 : index
      %c0_12 = arith.constant 0 : index
      %13 = vector.load %arg7[%c0_11, %c0_12] : memref<8x64xf32, #tpu.memory_space<vmem>>, vector<8x64xf32>
      tpu.vector_store %arg7[%c0_11, %c0_12], %12 {strides = array<i32>} : memref<8x64xf32, #tpu.memory_space<vmem>>, vector<8x64xf32>,
    } else {
    }
    %c0 = arith.constant 0 : index
    %c0_1 = arith.constant 0 : index
    %3 = vector.load %arg7[%c0, %c0_1] : memref<8x64xf32, #tpu.memory_space<vmem>>, vector<8x64xf32>
    %c0_2 = arith.constant 0 : index
    %c0_3 = arith.constant 0 : index
    %4 = vector.load %arg3[%c0_2, %c0_3] : memref<8x32xbf16, #tpu.memory_space<vmem>>, vector<8x32xbf16>
    %c0_4 = arith.constant 0 : index
    %c0_5 = arith.constant 0 : index
    %5 = vector.load %arg4[%c0_4, %c0_5] : memref<32x64xbf16, #tpu.memory_space<vmem>>, vector<32x64xbf16>
    %cst = arith.constant dense<0.000000e+00> : vector<8x64xf32>
    %6 = tpu.matmul %4, %5, %cst {dimension_numbers = #tpu.dot_dimension_numbers<[1], [0], [0], [1], [0, 0, 1, 1], [], []>} : vector<8x32xbf16>, vector<32x64xbf16>, vector<8x64xf32> -> vector<8x64xf32>
    %7 = arith.addf %3, %6 : vector<8x64xf32>
    %c0_6 = arith.constant 0 : index
    %c0_7 = arith.constant 0 : index
    %8 = vector.load %arg7[%c0_6, %c0_7] : memref<8x64xf32, #tpu.memory_space<vmem>>, vector<8x64xf32>
    tpu.vector_store %arg7[%c0_6, %c0_7], %7 {strides = array<i32>} : memref<8x64xf32, #tpu.memory_space<vmem>>, vector<8x64xf32>,
    %c0_i32_8 = arith.constant 0 : i32
    %9 = arith.cmpi eq, %arg2, %c0_i32_8 : i32
    %10 = arith.extui %9 : i1 to i32
    %c0_i32_9 = arith.constant 0 : i32
    %11 = arith.cmpi ne, %10, %c0_i32_9 : i32
    scf.if %11 {
      %c0_10 = arith.constant 0 : index
      %c0_11 = arith.constant 0 : index
      %12 = vector.load %arg7[%c0_10, %c0_11] : memref<8x64xf32, #tpu.memory_space<vmem>>, vector<8x64xf32>
      %c0_12 = arith.constant 0 : index
      %c0_13 = arith.constant 0 : index
      %13 = vector.load %arg5[%c0_12, %c0_13] : memref<1x64xf32, #tpu.memory_space<vmem>>, vector<1x64xf32>
      %14 = vector.broadcast %13 : vector<1x64xf32> to vector<8x64xf32>
      %15 = arith.addf %12, %14 : vector<8x64xf32>
      %cst_14 = arith.constant 5.000000e-01 : f32
      %16 = vector.broadcast %cst_14 : f32 to vector<8x64xf32>
      %17 = arith.mulf %16, %15 : vector<8x64xf32>
      %cst_15 = arith.constant 4.471500e-02 : f32
      %18 = vector.broadcast %cst_15 : f32 to vector<8x64xf32>
      %19 = arith.mulf %18, %15 : vector<8x64xf32>
      %20 = arith.mulf %19, %15 : vector<8x64xf32>
      %21 = arith.mulf %20, %15 : vector<8x64xf32>
      %22 = arith.addf %15, %21 : vector<8x64xf32>
      %cst_16 = arith.constant 0.797884583 : f32
      %23 = vector.broadcast %cst_16 : f32 to vector<8x64xf32>
      %24 = arith.mulf %23, %22 : vector<8x64xf32>
      %25 = math.tanh %24 : vector<8x64xf32>
      %cst_17 = arith.constant 1.000000e+00 : f32
      %26 = vector.broadcast %cst_17 : f32 to vector<8x64xf32>
      %27 = arith.addf %26, %25 : vector<8x64xf32>
      %28 = arith.mulf %17, %27 : vector<8x64xf32>
      %29 = arith.truncf %28 : vector<8x64xf32> to vector<8x64xbf16>
      %c0_18 = arith.constant 0 : index
      %c0_19 = arith.constant 0 : index
      %30 = vector.load %arg6[%c0_18, %c0_19] : memref<8x64xbf16, #tpu.memory_space<vmem>>, vector<8x64xbf16>
      tpu.vector_store %arg6[%c0_18, %c0_19], %29 {strides = array<i32>} : memref<8x64xbf16, #tpu.memory_space<vmem>>, vector<8x64xbf16>,
    } else {
    }
    return
  }
  func.func @transform_0(%arg0: i32, %arg1: i32, %arg2: i32) -> (i32, i32) {
    %c0_i32 = arith.constant 0 : i32
    return %arg0, %arg2 : i32, i32
  }
  func.func @transform_1(%arg0: i32, %arg1: i32, %arg2: i32) -> (i32, i32) {
    %c0_i32 = arith.constant 0 : i32
    return %arg2, %arg1 : i32, i32
  }
  func.func @transform_2(%arg0: i32, %arg1: i32, %arg2: i32) -> (i32, i32) {
    %c0_i32 = arith.constant 0 : i32
    %c0_i32_0 = arith.constant 0 : i32
    return %c0_i32, %arg1 : i32, i32
  }
  func.func @transform_3(%arg0: i32, %arg1: i32, %arg2: i32) -> (i32, i32) {
    %c0_i32 = arith.constant 0 : i32
    return %arg0, %arg1 : i32, i32
  }
}

module attributes {stable_mosaic.version = 11 : i64} {
  func.func @kernel(%arg0: memref<2x32xbf16, #tpu.memory_space<vmem>>, %arg1: memref<32x32xbf16, #tpu.memory_space<vmem>>, %arg2: memref<1x32xf32, #tpu.memory_space<vmem>>, %arg3: memref<32x128xbf16, #tpu.memory_space<vmem>>, %arg4: memref<1x128xf32, #tpu.memory_space<vmem>>, %arg5: memref<2x128xf32, #tpu.memory_space<vmem>>) attributes {dimension_semantics = [], scalar_prefetch = 0 : i64, scratch_operands = 0 : i64, tpu.core_type = #tpu.core_type<tc>} {
    %c0 = arith.constant 0 : index
    %c0_0 = arith.constant 0 : index
    %0 = vector.load %arg0[%c0, %c0_0] : memref<2x32xbf16, #tpu.memory_space<vmem>>, vector<2x32xbf16>
    %c0_1 = arith.constant 0 : index
    %c0_2 = arith.constant 0 : index
    %1 = vector.load %arg1[%c0_1, %c0_2] : memref<32x32xbf16, #tpu.memory_space<vmem>>, vector<32x32xbf16>
    %cst = arith.constant dense<0.000000e+00> : vector<2x32xf32>
    %2 = tpu.matmul %0, %1, %cst {dimension_numbers = #tpu.dot_dimension_numbers<[1], [0], [0], [1], [0, 0, 1, 1], [], []>} : vector<2x32xbf16>, vector<32x32xbf16>, vector<2x32xf32> -> vector<2x32xf32>
    %c0_3 = arith.constant 0 : index
    %c0_4 = arith.constant 0 : index
    %3 = vector.load %arg2[%c0_3, %c0_4] : memref<1x32xf32, #tpu.memory_space<vmem>>, vector<1x32xf32>
    %4 = vector.broadcast %3 : vector<1x32xf32> to vector<2x32xf32>
    %5 = arith.addf %2, %4 : vector<2x32xf32>
    %6 = math.tanh %5 : vector<2x32xf32>
    %7 = arith.truncf %6 : vector<2x32xf32> to vector<2x32xbf16>
    %c0_5 = arith.constant 0 : index
    %c0_6 = arith.constant 0 : index
    %8 = vector.load %arg3[%c0_5, %c0_6] : memref<32x128xbf16, #tpu.memory_space<vmem>>, vector<32x128xbf16>
    %cst_7 = arith.constant dense<0.000000e+00> : vector<2x128xf32>
    %9 = tpu.matmul %7, %8, %cst_7 {dimension_numbers = #tpu.dot_dimension_numbers<[1], [0], [0], [1], [0, 0, 1, 1], [], []>} : vector<2x32xbf16>, vector<32x128xbf16>, vector<2x128xf32> -> vector<2x128xf32>
    %c0_8 = arith.constant 0 : index
    %c0_9 = arith.constant 0 : index
    %10 = vector.load %arg4[%c0_8, %c0_9] : memref<1x128xf32, #tpu.memory_space<vmem>>, vector<1x128xf32>
    %11 = vector.broadcast %10 : vector<1x128xf32> to vector<2x128xf32>
    %12 = arith.addf %9, %11 : vector<2x128xf32>
    %c0_10 = arith.constant 0 : index
    %c0_11 = arith.constant 0 : index
    %13 = vector.load %arg5[%c0_10, %c0_11] : memref<2x128xf32, #tpu.memory_space<vmem>>, vector<2x128xf32>
    tpu.vector_store %arg5[%c0_10, %c0_11], %12 {strides = array<i32>} : memref<2x128xf32, #tpu.memory_space<vmem>>, vector<2x128xf32>,
    return
  }
}

</mosaic_0001>

<bundles_post_ra>
// kernel: _lambda_.15
= control target key start
LH: loop header
LB: loop body
LE: loop exit
PB: predicated region body
PF: predicated region fallthrough
CT: control target
= control target key end

     0   :  { %s639_s21 = smov 0   ;;  %s641_s22 = smov 0   ;;  %s700_s0 = inlined_call_operand.vmem [shape: bf16[16,32], index: 0, kind: input, shape index: {}]   ;;  %s701_s1 = inlined_call_operand.vmem [shape: bf16[32,32], index: 1, kind: input, shape index: {}]   ;;  %s702_s2 = inlined_call_operand.vmem [shape: f32[1,32], index: 2, kind: input, shape index: {}]   ;;  %s703_s3 = inlined_call_operand.vmem [shape: bf16[16,32], index: 3, kind: input, shape index: {}]   ;;  %s704_s4 = inlined_call_operand.vmem [shape: f32[1,32], index: 4, kind: input, shape index: {}]   ;;  %s705_s5 = inlined_call_operand.vmem [shape: f32[1,32], index: 5, kind: input, shape index: {}]   ;;  %s706_s6 = inlined_call_operand.vmem [shape: bf16[16,32], index: 6, kind: output, shape index: {}]  }
   0x1   :  { %s643_s23 = smov 0  }
   0x2 LB: > { %s28_s24 = sadd.s32 1, %s596_s22  ;;  %p525_p0 = scmp.ge.s32.totalorder %s600_s23, 1  ;;  %s600_s23 = sphi %s643_s23, %s16_s23   ;;  %s596_s22 = sphi %s641_s22, %s708_s22   ;;  %s592_s21 = sphi %s639_s21, %s707_s21  }
   0x3   : > { %p30_p1 = scmp.ge.s32.totalorder %s28_s24, 2  ;;  %p248_p2 = scmp.lt.s32.totalorder %s600_s23, 3 }
   0x5   : > { %s710_s24 = smov (%p30_p1, %s28_s24), 0  ;;  %p249_p3 = pnand %p525_p0, %p248_p2 }
   0x6   : > { %p288_p4 = scmp.lt.s32.totalorder (!%p249_p3), %s592_s21, 1 }
   0x7   : > { %252 = sbr.rel (%p249_p3) target bundleno = 539 (0x21b), region = 44 }
   0xc   : > { %v574_v0 = vld [vmem:[%s701_s1 + $0x8] sm:$0xff]   ;;  %v602_v1 = vmov 0.0   ;;  %v575_v2 = vld [vmem:[%s701_s1] sm:$0xff]   ;;  %vm603_vm0 = vmmov 0   ;;  %vm314_vm1 = vcmask 261120   ;;  %s712_s21 = smov (!%p288_p4, %s592_s21), 1 }
   0xd   : > { %540 = vmatprep.subr.bf16.mxu0 %v602_v1  ;;  %544 = vmatprep.mubr.msk.bf16.mxu0 %vm603_vm0, %v602_v1  ;;  %315 = vst.msk [vmem:[#allocation2] sm:$0xff] %vm314_vm1, %v602_v1  ;;  %s664_s29 = sshll.u32 %s712_s21, 2  ;;  %v532_v11 = vld [vmem:[%s702_s2] ss:$0 sm:$0xff]  ;;  %vm426_vm2 = vcmask 257024  }
   0xe   : > { %541 = vmatpush3.bf16.msra.mxu0 %v574_v0  ;;  %s294_s8 = scalar_lea.vmem %s700_s0, %s664_s29  ;;  %s304_s11 = scalar_lea.vmem %s703_s3, %s664_s29  ;;  %v533_v26 = vld [vmem:[%s704_s4] ss:$0 sm:$0xff] }
   0xf   : > { %542 = vmatprep.subr.bf16.mxu0 %v602_v1  ;;  %v317_v3 = vld [vmem:[%s294_s8] sm:$0xf]  ;;  %s308_s20 = scalar_lea.vmem %s706_s6, %s664_s29 }
  0x10   : > { %v392_v10 = vld [vmem:[%s304_s11] sm:$0xf] }
  0x11   : > { %v393_v12 = vunpack.c.l.bf16 %v392_v10  ;;  %v534_v28 = vld [vmem:[%s705_s5] ss:$0 sm:$0xff] }
  0x12   : > { %543 = vmatpush3.bf16.msra.mxu0 %v575_v2 }
  0x14   : > { %v316_v4 = vld [vmem:[#allocation2] sm:$0xff] }
  0x15   : > { %545 = vmatmul.mubr.msk.bf16.vlgmr.msra.gmra.mxu0 %vm314_vm1, %v317_v3 }
  0xd5   : > { %v372_v5 = vpop.f32.mrf.mxu0 }
  0xd6   : > { %v378_v6 = vadd.f32 %v372_v5, %v316_v4 }
  0xd7   : > { %v546_v7 = vpop.f32.mrf.mxu0 }
  0xd8   : > { %379 = vst.msk [vmem:[#allocation2] sm:$0xff] %vm314_vm1, %v378_v6 }
  0xd9   : > { %v375_v8 = vpop.f32.mrf.mxu0 }
  0xdb   : > { %v547_v9 = vpop.f32.mrf.mxu0 }
  0xdf   : > { %v383_v13 = vld [vmem:[#allocation2] sm:$0xff] }
  0xe0   : > { %v391_v14 = vadd.f32 %v532_v11, %v383_v13 }
  0xe2   : > { %v394_v15 = vadd.f32 %v393_v12, %v391_v14 }
  0xe4   : > { %v395_v16 = vsel %vm314_vm1, %v394_v15, 0.0 }
  0xe5   : > { %396 = vadd.xlane.f32.xlu0 %v395_v16 }
 0x16e   : > { %v397_v17 = vpop.xlane.xlu0 %396 }
 0x16f   : > { %v399_v18 = vmul.f32 0.03125, %v397_v17 }
 0x171   : > { %v400_v19 = vsub.f32 %v394_v15, %v399_v18 }
 0x173   : > { %v401_v20 = vmul.f32 %v400_v19, %v400_v19 }
 0x175   : > { %v402_v21 = vsel %vm314_vm1, %v401_v20, 0.0 }
 0x176   : > { %403 = vadd.xlane.f32.xlu0 %v402_v21 }
 0x1ff   : > { %v404_v22 = vpop.xlane.xlu0 %403 }
 0x200   : > { %v405_v23 = vmul.f32 0.03125, %v404_v22 }
 0x202   : > { %v406_v24 = vadd.f32 1e-12, %v405_v23 }
 0x204   : > { %576 = vrsqrt.f32 %v406_v24 }
 0x211   : > { %v577_v25 = vpop.eup %576 }
 0x212   : > { %v408_v27 = vmul.f32 %v577_v25, %v400_v19 }
 0x214   : > { %v416_v29 = vmul.f32 %v533_v26, %v408_v27 }
 0x216   : > { %v424_v30 = vadd.f32 %v534_v28, %v416_v29 }
 0x218   : > { %v425_v31 = vpack.c.bf16 %v424_v30, %v424_v30 }
 0x21a   : > { %427 = vst.msk [vmem:[%s308_s20] sm:$0xf] %vm426_vm2, %v425_v31 }
 0x21b PF: > { %s16_s23 = sadd.s32 1, %s600_s23   ;;  %s707_s21 = smov %s596_s22 }
 0x21c   : > { %p13_p5 = scmp.ge.s32.totalorder %s16_s23, 4   ;;  %s708_s22 = smov %s710_s24 }
 0x21e   :  { %15 = sbr.rel (!%p13_p5) target bundleno = 2 (0x2), region = 88 }

// kernel: _lambda_.13
= control target key start
LH: loop header
LB: loop body
LE: loop exit
PB: predicated region body
PF: predicated region fallthrough
CT: control target
= control target key end

     0   :  { %s645_s18 = smov 0   ;;  %s647_s19 = smov 0   ;;  %s701_s0 = inlined_call_operand.vmem [shape: bf16[16,32], index: 0, kind: input, shape index: {}]   ;;  %s702_s1 = inlined_call_operand.vmem [shape: bf16[32,96], index: 1, kind: input, shape index: {}]   ;;  %s703_s2 = inlined_call_operand.vmem [shape: f32[1,96], index: 2, kind: input, shape index: {}]   ;;  %s704_s3 = inlined_call_operand.vmem [shape: bf16[16,32], index: 3, kind: output, shape index: {0}]   ;;  %s705_s4 = inlined_call_operand.vmem [shape: bf16[16,32], index: 4, kind: output, shape index: {1}]   ;;  %s706_s5 = inlined_call_operand.vmem [shape: bf16[16,32], index: 5, kind: output, shape index: {2}]  }
   0x1   :  { %s649_s20 = smov 0  }
   0x2 LB: > { %s28_s21 = sadd.s32 1, %s605_s19  ;;  %p533_p0 = scmp.ge.s32.totalorder %s609_s20, 1  ;;  %s609_s20 = sphi %s649_s20, %s16_s20   ;;  %s605_s19 = sphi %s647_s19, %s708_s19   ;;  %s601_s18 = sphi %s645_s18, %s707_s18  }
   0x3   : > { %p30_p1 = scmp.ge.s32.totalorder %s28_s21, 2  ;;  %p219_p2 = scmp.lt.s32.totalorder %s609_s20, 3 }
   0x5   : > { %s710_s21 = smov (%p30_p1, %s28_s21), 0  ;;  %p220_p3 = pnand %p533_p0, %p219_p2 }
   0x6   : > { %p261_p4 = scmp.lt.s32.totalorder (!%p220_p3), %s601_s18, 1  ;;  %s613_s10 = smov (!%p220_p3), 96  }
   0x7   : > { %223 = sbr.rel (%p220_p3) target bundleno = 348 (0x15c), region = 32  ;;  %s614_s11 = smov (!%p220_p3), 64  }
   0xc   : > { %vm291_vm0 = vcmask 785408   ;;  %v611_v0 = vmov 0.0   ;;  %v585_v1 = vld [vmem:[%s702_s1 + $0x8] sm:$0xff]   ;;  %vm612_vm1 = vmmov 0   ;;  %v586_v2 = vld [vmem:[%s702_s1] sm:$0xff]   ;;  %s712_s18 = smov (!%p261_p4, %s601_s18), 1 }
   0xd   : > { %292 = vst.msk [vmem:[#allocation2] sm:$0xff] %vm291_vm0, %v611_v0  ;;  %549 = vmatprep.subr.bf16.mxu0 %v611_v0  ;;  %553 = vmatprep.mubr.msk.bf16.mxu0 %vm612_vm1, %v611_v0  ;;  %s670_s26 = sshll.u32 %s712_s18, 2  ;;  %vm311_vm2 = vcmask 261120   ;;  %v541_v10 = vld [vmem:[%s703_s2] ss:$0 sm:$0xff]  ;;  %vm372_vm3 = vcmask 257024  }
   0xe   : > { %550 = vmatpush3.bf16.msra.mxu0 %v585_v1  ;;  %s267_s29 = scalar_lea.vmem %s701_s0, %s670_s26  ;;  %s277_s9 = scalar_lea.vmem %s704_s3, %s670_s26 }
   0xf   : > { %551 = vmatprep.subr.bf16.mxu0 %v611_v0  ;;  %v294_v3 = vld [vmem:[%s267_s29] sm:$0xf]  ;;  %s281_s14 = scalar_lea.vmem %s705_s4, %s670_s26  ;;  %s285_s17 = scalar_lea.vmem %s706_s5, %s670_s26 }
  0x12   : > { %552 = vmatpush3.bf16.msra.mxu0 %v586_v2 }
  0x14   : > { %v293_v4 = vld [vmem:[#allocation2] sm:$0xff] }
  0x15   : > { %554 = vmatmul.mubr.msk.bf16.vlgmr.msra.gmra.mxu0 %vm311_vm2, %v294_v3 }
  0xd5   : > { %v349_v5 = vpop.f32.mrf.mxu0 }
  0xd6   : > { %v355_v6 = vadd.f32 %v349_v5, %v293_v4 }
  0xd7   : > { %v555_v7 = vpop.f32.mrf.mxu0 }
  0xd8   : > { %357 = vst.msk [vmem:[#allocation2] sm:$0xff] %vm291_vm0, %v355_v6 }
  0xd9   : > { %v352_v8 = vpop.f32.mrf.mxu0 }
  0xdb   : > { %v556_v9 = vpop.f32.mrf.mxu0 }
  0xdf   : > { %v361_v11 = vld [vmem:[#allocation2] sm:$0xff] }
  0xe0   : > { %v369_v12 = vadd.f32 %v541_v10, %v361_v11 }
  0xe2   : > { %v545_v13 = vpack.c.bf16 %v369_v12, %v369_v12  ;;  %v370_v14 = vmul.f32 0.35355338, %v369_v12 }
  0xe4   : > { %378 = vrot.lane.b32.xlu0 %v545_v13, %s613_s10  ;;  %v371_v15 = vpack.c.bf16 %v370_v14, %v370_v14 }
  0xe6   : > { %373 = vst.msk [vmem:[%s277_s9] sm:$0xf] %vm372_vm3, %v371_v15 }
  0xe8   : > { %382 = vrot.lane.b32.xlu0 %v545_v13, %s614_s11 }
 0x156   : > { %v379_v16 = vpop.permute.xlu0 %378 }
 0x157   : > { %381 = vst.msk [vmem:[%s281_s14] sm:$0xf] %vm372_vm3, %v379_v16 }
 0x15a   : > { %v383_v17 = vpop.permute.xlu0 %382 }
 0x15b   : > { %385 = vst.msk [vmem:[%s285_s17] sm:$0xf] %vm372_vm3, %v383_v17 }
 0x15c PF: > { %s16_s20 = sadd.s32 1, %s609_s20   ;;  %s707_s18 = smov %s605_s19 }
 0x15d   : > { %p13_p5 = scmp.ge.s32.totalorder %s16_s20, 4   ;;  %s708_s19 = smov %s710_s21 }
 0x15f   :  { %15 = sbr.rel (!%p13_p5) target bundleno = 2 (0x2), region = 97 }

// kernel: _lambda_.12
= control target key start
LH: loop header
LB: loop body
LE: loop exit
PB: predicated region body
PF: predicated region fallthrough
CT: control target
= control target key end

     0   :  { %s455_s15 = smov 0   ;;  %s457_s16 = smov 0   ;;  %s497_s0 = inlined_call_operand.vmem [shape: f32[2,8,32], index: 0, kind: input, shape index: {}]   ;;  %s498_s1 = inlined_call_operand.vmem [shape: f32[1,8,32], index: 1, kind: input, shape index: {}]   ;;  %s499_s2 = inlined_call_operand.vmem [shape: f32[1,1,32], index: 2, kind: input, shape index: {}]   ;;  %s500_s3 = inlined_call_operand.vmem [shape: f32[1,1,32], index: 3, kind: input, shape index: {}]   ;;  %s501_s4 = inlined_call_operand.vmem [shape: bf16[2,8,32], index: 4, kind: output, shape index: {}]  }
   0x1   :  { %s459_s17 = smov 0  }
   0x2 LB: > { %s26_s18 = sadd.s32 1, %s424_s16  ;;  %p373_p0 = scmp.ge.s32.totalorder %s428_s17, 1  ;;  %s428_s17 = sphi %s459_s17, %s14_s17   ;;  %s424_s16 = sphi %s457_s16, %s503_s16   ;;  %s420_s15 = sphi %s455_s15, %s502_s15  }
   0x3   : > { %p28_p1 = scmp.ge.s32.totalorder %s26_s18, 2  ;;  %p189_p2 = scmp.lt.s32.totalorder %s428_s17, 3 }
   0x5   : > { %s505_s18 = smov (%p28_p1, %s26_s18), 0  ;;  %p190_p3 = pnand %p373_p0, %p189_p2 }
   0x6   : > { %p223_p4 = scmp.lt.s32.totalorder (!%p190_p3), %s420_s15, 1 }
   0x7   : > { %193 = sbr.rel (%p190_p3) target bundleno = 329 (0x149), region = 36 }
   0xc   : > { %s507_s15 = smov (!%p223_p4, %s420_s15), 1  ;;  %v242_v0 = vld [vmem:[%s498_s1] sm:$0xff]  ;;  %vm244_vm0 = vcmask 261120   ;;  %vm276_vm1 = vcmask 257024  }
   0xd   : > { %s374_s19 = sshll.u32 %s507_s15, 3  ;;  %v376_v13 = vld [vmem:[%s499_s2] ss:$0 sm:$0xff]  ;;  %s375_s29 = sshll.u32 %s507_s15, 2 }
   0xe   : > { %s229_s24 = scalar_lea.vmem %s497_s0, %s374_s19  ;;  %v377_v15 = vld [vmem:[%s500_s3] ss:$0 sm:$0xff]  ;;  %s240_s6 = scalar_lea.vmem %s501_s4, %s375_s29 }
   0xf   : > { %v241_v1 = vld [vmem:[%s229_s24] sm:$0xff] }
  0x10   : > { %v243_v2 = vadd.f32 %v242_v0, %v241_v1 }
  0x12   : > { %v245_v3 = vsel %vm244_vm0, %v243_v2, 0.0 }
  0x13   : > { %246 = vadd.xlane.f32.xlu0 %v245_v3 }
  0x9c   : > { %v247_v4 = vpop.xlane.xlu0 %246 }
  0x9d   : > { %v249_v5 = vmul.f32 0.03125, %v247_v4 }
  0x9f   : > { %v250_v6 = vsub.f32 %v243_v2, %v249_v5 }
  0xa1   : > { %v251_v7 = vmul.f32 %v250_v6, %v250_v6 }
  0xa3   : > { %v252_v8 = vsel %vm244_vm0, %v251_v7, 0.0 }
  0xa4   : > { %253 = vadd.xlane.f32.xlu0 %v252_v8 }
 0x12d   : > { %v254_v9 = vpop.xlane.xlu0 %253 }
 0x12e   : > { %v255_v10 = vmul.f32 0.03125, %v254_v9 }
 0x130   : > { %v256_v11 = vadd.f32 1e-12, %v255_v10 }
 0x132   : > { %404 = vrsqrt.f32 %v256_v11 }
 0x13f   : > { %v405_v12 = vpop.eup %404 }
 0x140   : > { %v258_v14 = vmul.f32 %v405_v12, %v250_v6 }
 0x142   : > { %v266_v16 = vmul.f32 %v376_v13, %v258_v14 }
 0x144   : > { %v274_v17 = vadd.f32 %v377_v15, %v266_v16 }
 0x146   : > { %v275_v18 = vpack.c.bf16 %v274_v17, %v274_v17 }
 0x148   : > { %277 = vst.msk [vmem:[%s240_s6] sm:$0xf] %vm276_vm1, %v275_v18 }
 0x149 PF: > { %s14_s17 = sadd.s32 1, %s428_s17   ;;  %s502_s15 = smov %s424_s16 }
 0x14a   : > { %p11_p5 = scmp.ge.s32.totalorder %s14_s17, 4   ;;  %s503_s16 = smov %s505_s18 }
 0x14c   :  { %13 = sbr.rel (!%p11_p5) target bundleno = 2 (0x2), region = 69 }

// kernel: _lambda_.14
= control target key start
LH: loop header
LB: loop body
LE: loop exit
PB: predicated region body
PF: predicated region fallthrough
CT: control target
= control target key end

     0   :  { %s1299_s15 = smov 0   ;;  %s1301_s16 = smov 0   ;;  %s1468_s0 = inlined_call_operand.vmem [shape: bf16[2,8,32], index: 0, kind: input, shape index: {}]   ;;  %s1469_s1 = inlined_call_operand.vmem [shape: bf16[2,8,32], index: 1, kind: input, shape index: {}]   ;;  %s1470_s2 = inlined_call_operand.vmem [shape: bf16[2,8,32], index: 2, kind: input, shape index: {}]   ;;  %s1471_s3 = inlined_call_operand.vmem [shape: f32[2,1,8], index: 3, kind: input, shape index: {}]   ;;  %s1472_s4 = inlined_call_operand.vmem [shape: bf16[2,8,32], index: 4, kind: output, shape index: {}]  }
   0x1   :  { %s1303_s17 = smov 0  }
   0x2 LB: > { %s33_s18 = sadd.s32 1, %s1258_s16  ;;  %p1096_p0 = scmp.ge.s32.totalorder %s1262_s17, 1  ;;  %s1262_s17 = sphi %s1303_s17, %s14_s17   ;;  %s1258_s16 = sphi %s1301_s16, %s1474_s16   ;;  %s1254_s15 = sphi %s1299_s15, %s1473_s15  }
   0x3   : > { %p35_p1 = scmp.ge.s32.totalorder %s33_s18, 2  ;;  %p238_p2 = scmp.lt.s32.totalorder %s1262_s17, 3 }
   0x5   : > { %s1476_s18 = smov (%p35_p1, %s33_s18), 0  ;;  %p239_p3 = pnand %p1096_p0, %p238_p2 }
   0x6   : > { %p294_p4 = scmp.lt.s32.totalorder (!%p239_p3), %s1254_s15, 1  ;;  %s1268_s29 = smov (!%p239_p3), 120  }
   0x7   : > { %242 = sbr.rel (%p239_p3) target bundleno = 1414 (0x586), region = 36  ;;  %s1269_s30 = smov (!%p239_p3), 112  }
   0x8   : > { %s1270_s5 = smov (!%p239_p3), 104   ;;  %s1271_s9 = smov (!%p239_p3), 8  }
   0x9   : > { %s1272_s10 = smov (!%p239_p3), 16   ;;  %s1273_s11 = smov (!%p239_p3), 24  }
   0xc   : > { %vm348_vm0 = vcmask 64512   ;;  %v1264_v0 = vmov 0.0   ;;  %vm1265_vm1 = vmmov 0   ;;  %s1478_s15 = smov (!%p294_p4, %s1254_s15), 1  ;;  %vm339_vm2 = vcmask 7168  }
   0xd   : > { %1130 = vmatprep.subr.bf16.mxu0 %v1264_v0  ;;  %349 = vst.msk [vmem:[#allocation4] sm:$0xff] %vm348_vm0, %v1264_v0  ;;  %350 = vst.msk [vmem:[#allocation4 + $0x8] sm:$0xff] %vm348_vm0, %v1264_v0  ;;  %1132 = vmatprep.mubr.msk.bf16.mxu0 %vm1265_vm1, %v1264_v0  ;;  %s1331_s19 = sshll.u32 %s1478_s15, 2  ;;  %v1266_v4 = vmov -inf   ;;  %s326_s28 = scalar_lea.vmem %s1471_s3, %s1478_s15  ;;  %v360_v5 = vlaneseq  ;;  %v1267_v18 = vmov 0   ;;  %vm447_vm3 = vcmask 1043456  }
   0xe   : > { %351 = vst.msk [vmem:[#allocation4 + $0x10] sm:$0xff] %vm348_vm0, %v1264_v0  ;;  %352 = vst.msk [vmem:[#allocation4 + $0x18] sm:$0xff] %vm348_vm0, %v1264_v0  ;;  %1136 = vmatprep.subr.bf16.mxu1 %v1264_v0  ;;  %1138 = vmatprep.mubr.msk.bf16.mxu1 %vm1265_vm1, %v1264_v0  ;;  %s310_s22 = scalar_lea.vmem %s1469_s1, %s1331_s19  ;;  %s300_s25 = scalar_lea.vmem %s1468_s0, %s1331_s19  ;;  %v353_v6 = vld [vmem:[%s326_s28] sm:$0x1]  ;;  %vm960_vm4 = vcmask 130048   ;;  %vm962_vm5 = vcmask 195584  }
   0xf   : > { %v357_v1 = vld [vmem:[%s310_s22] sm:$0xf]  ;;  %340 = vst.msk [vmem:[#allocation2] sm:$0xff] %vm339_vm2, %v1266_v4  ;;  %341 = vst.msk [vmem:[#allocation2 + $0x8] sm:$0xff] %vm339_vm2, %v1266_v4  ;;  %v354_v7 = vsub.f32 1.0, %v353_v6  ;;  %v361_v8 = vshrl.u32 %v360_v5, 7  ;;  %1212 = vset.pattern.permute.xlu0 %v1267_v18  ;;  %1213 = vset.pattern.permute.xlu1 %v1267_v18  ;;  %s320_s8 = scalar_lea.vmem %s1470_s2, %s1331_s19  ;;  %s333_s14 = scalar_lea.vmem %s1472_s4, %s1331_s19 }
  0x10   : > { %v370_v2 = vsel %vm348_vm0, %v357_v1, 0  ;;  %v356_v3 = vld [vmem:[%s300_s25] sm:$0xf]  ;;  %342 = vst.msk [vmem:[#allocation2 + $0x10] sm:$0xff] %vm339_vm2, %v1266_v4  ;;  %343 = vst.msk [vmem:[#allocation2 + $0x18] sm:$0xff] %vm339_vm2, %v1266_v4  ;;  %v1104_v19 = vcombine.low %v357_v1, %v357_v1  ;;  %vm965_vm6 = vcmask 257024  }
  0x11   : > { %1131 = vmatpush3.bf16.xpose.msra.mxu0 %v370_v2  ;;  %344 = vst.msk [vmem:[#allocation3] sm:$0xff] %vm339_vm2, %v1264_v0  ;;  %345 = vst.msk [vmem:[#allocation3 + $0x8] sm:$0xff] %vm339_vm2, %v1264_v0  ;;  %v355_v9 = vmul.f32 -10000.0, %v354_v7  ;;  %v362_v10 = vsub.s32 0, %v361_v8  ;;  %v1103_v20 = vcombine.low %v356_v3, %v356_v3  ;;  %v1385_v25 = vld [vmem:[%s320_s8] sm:$0xf] }
  0x12   : > { %1148 = vmatprep.subr.bf16.mxu0 %v1264_v0  ;;  %346 = vst.msk [vmem:[#allocation3 + $0x10] sm:$0xff] %vm339_vm2, %v1264_v0  ;;  %347 = vst.msk [vmem:[#allocation3 + $0x18] sm:$0xff] %vm339_vm2, %v1264_v0  ;;  %502 = vrot.lane.b32.xlu1 %v1104_v19, %s1268_s29  ;;  %v449_v26 = vsel %vm447_vm3, %v1385_v25, 0 }
  0x13   : > { %v1361_v11 = vrot.slane %v355_v9, %v362_v10  ;;  %1137 = vmatpush3.bf16.msra.mxu1 %v449_v26 }
  0x14   : > { %1142 = vmatprep.subr.bf16.mxu1 %v1264_v0 }
  0x16   : > { %497 = vrot.lane.b32.xlu1 %v1103_v20, %s1268_s29  ;;  %v1371_v21 = vld [vmem:[#allocation2] sm:$0xff]  ;;  %v551_v63 = vld [vmem:[#allocation2 + $0x8] sm:$0xff] }
  0x17   : > { %v689_v4 = vld [vmem:[#allocation2 + $0x10] sm:$0xff]  ;;  %v824_v8 = vld [vmem:[#allocation2 + $0x18] sm:$0xff] }
  0x18   : > { %1133 = vmatmul.mubr.msk.bf16.vlgmr.msra.gmra.mxu0 %vm348_vm0, %v356_v3 }
  0x19   : > { %1150 = vmatprep.mubr.msk.bf16.mxu0 %vm1265_vm1, %v1264_v0 }
  0x1a   : > { %640 = vrot.lane.b32.xlu1 %v1104_v19, %s1269_s30 }
  0x1e   : > { %638 = vrot.lane.b32.xlu1 %v1103_v20, %s1269_s30 }
  0x22   : > { %775 = vrot.lane.b32.xlu1 %v1104_v19, %s1270_s5 }
  0x26   : > { %773 = vrot.lane.b32.xlu1 %v1103_v20, %s1270_s5 }
  0x84   : > { %v503_v30 = vpop.permute.xlu1 %502 }
  0x85   : > { %v508_v33 = vsel %vm348_vm0, %v503_v30, 0 }
  0x88   : > { %v498_v31 = vpop.permute.xlu1 %497 }
  0x8c   : > { %v641_v35 = vpop.permute.xlu1 %640 }
  0x8d   : > { %v646_v37 = vsel %vm348_vm0, %v641_v35, 0 }
  0x90   : > { %v639_v36 = vpop.permute.xlu1 %638 }
  0x94   : > { %v776_v38 = vpop.permute.xlu1 %775 }
  0x95   : > { %v781_v39 = vsel %vm348_vm0, %v776_v38, 0 }
  0x98   : > { %v774_v40 = vpop.permute.xlu1 %773 }
  0xd8   : > { %v406_v12 = vpop.f32.mrf.mxu0 }
  0xd9   : > { %v407_v13 = vadd.f32 %v406_v12, %v1361_v11 }
  0xda   : > { %v1134_v14 = vpop.f32.mrf.mxu0 }
  0xdb   : > { %v413_v15 = vsel %vm348_vm0, %v407_v13, -inf }
  0xdc   : > { %414 = vmax.xlane.f32.xlu0 %v413_v15  ;;  %v409_v16 = vpop.f32.mrf.mxu0 }
  0xde   : > { %v1135_v17 = vpop.f32.mrf.mxu0 }
 0x165   : > { %v415_v22 = vpop.xlane.xlu0 %414 }
 0x166   : > { %v1374_v23 = vmax.f32 %v1371_v21, %v415_v22 }
 0x168   : > { %v417_v24 = vsub.f32 %v1371_v21, %v1374_v23  ;;  %493 = vst.msk [vmem:[#allocation2] sm:$0xff] %vm339_vm2, %v1374_v23  ;;  %422 = vperm.xlu0 %1212, %v1374_v23  }
 0x16a   : > { %v418_v38 = vmul.f32 1.442695, %v417_v24 }
 0x1e3   : > { %v423_v27 = vpop.permute.xlu0 %422 }
 0x1e4   : > { %v425_v28 = vsub.f32 %v407_v13, %v423_v27 }
 0x1e6   : > { %v426_v29 = vmul.f32 1.442695, %v425_v28 }
 0x1e8   : > { %1216 = vpow2.f32 %v426_v29 }
 0x1f5   : > { %v1390_v32 = vpop.eup %1216 }
 0x1f6   : > { %v443_v34 = vpack.c.bf16 %v1390_v32, %v1390_v32  ;;  %v430_v13 = vsel %vm348_vm0, %v1390_v32, 0.0 }
 0x1f8   : > { %1139 = vmatmul.mubr.msk.bf16.vlgmr.msra.gmra.mxu1 %vm348_vm0, %v443_v34 }
 0x1f9   : > { %1143 = vmatpush3.bf16.xpose.msra.mxu1 %v508_v33  ;;  %1144 = vmatprep.mubr.msk.bf16.mxu1 %vm1265_vm1, %v1264_v0 }
 0x1fa   : > { %1154 = vmatprep.subr.bf16.mxu1 %v1264_v0 }
 0x200   : > { %1145 = vmatmul.mubr.msk.bf16.vlgmr.msra.gmra.mxu1 %vm348_vm0, %v498_v31 }
 0x201   : > { %1155 = vmatpush3.bf16.xpose.msra.mxu1 %v646_v37  ;;  %1156 = vmatprep.mubr.msk.bf16.mxu1 %vm1265_vm1, %v1264_v0 }
 0x202   : > { %1166 = vmatprep.subr.bf16.mxu1 %v1264_v0 }
 0x208   : > { %1157 = vmatmul.mubr.msk.bf16.vlgmr.msra.gmra.mxu1 %vm348_vm0, %v639_v36 }
 0x209   : > { %1167 = vmatpush3.bf16.xpose.msra.mxu1 %v781_v39  ;;  %1168 = vmatprep.mubr.msk.bf16.mxu1 %vm1265_vm1, %v1264_v0 }
 0x210   : > { %1169 = vmatmul.mubr.msk.bf16.vlgmr.msra.gmra.mxu1 %vm348_vm0, %v774_v40 }
 0x2b8   : > { %v1409_v41 = vpop.f32.mrf.mxu1 }
 0x2ba   : > { %v1140_v42 = vpop.f32.mrf.mxu1 }
 0x2bc   : > { %v488_v43 = vpop.f32.mrf.mxu1 }
 0x2be   : > { %v1141_v44 = vpop.f32.mrf.mxu1 }
 0x2c0   : > { %v544_v45 = vpop.f32.mrf.mxu1 }
 0x2c1   : > { %v545_v46 = vadd.f32 %v544_v45, %v1361_v11 }
 0x2c2   : > { %v1146_v47 = vpop.f32.mrf.mxu1 }
 0x2c3   : > { %v552_v48 = vsel %vm348_vm0, %v545_v46, -inf }
 0x2c4   : > { %553 = vmax.xlane.f32.xlu1 %v552_v48  ;;  %v547_v49 = vpop.f32.mrf.mxu1 }
 0x2c6   : > { %v1147_v50 = vpop.f32.mrf.mxu1 }
 0x2c8   : > { %v682_v51 = vpop.f32.mrf.mxu1 }
 0x2c9   : > { %v683_v52 = vadd.f32 %v682_v51, %v1361_v11 }
 0x2ca   : > { %v1158_v53 = vpop.f32.mrf.mxu1 }
 0x2cb   : > { %v690_v54 = vsel %vm348_vm0, %v683_v52, -inf }
 0x2cc   : > { %691 = vmax.xlane.f32.xlu0 %v690_v54  ;;  %v685_v55 = vpop.f32.mrf.mxu1 }
 0x2ce   : > { %v1159_v56 = vpop.f32.mrf.mxu1 }
 0x2cf   : > { %v706_v56 = vld [vmem:[#allocation3 + $0x10] sm:$0xff] }
 0x2d0   : > { %v817_v57 = vpop.f32.mrf.mxu1 }
 0x2d1   : > { %v818_v58 = vadd.f32 %v817_v57, %v1361_v11  ;;  %v1106_v11 = vcombine.low %v1385_v25, %v1385_v25 }
 0x2d2   : > { %v1170_v59 = vpop.f32.mrf.mxu1 }
 0x2d3   : > { %v825_v60 = vsel %vm348_vm0, %v818_v58, -inf }
 0x2d4   : > { %826 = vmax.xlane.f32.xlu1 %v825_v60  ;;  %v820_v61 = vpop.f32.mrf.mxu1 }
 0x2d5   : > { %v841_v61 = vld [vmem:[#allocation3 + $0x18] sm:$0xff] }
 0x2d6   : > { %v1171_v62 = vpop.f32.mrf.mxu1 }
 0x2d7   : > { %v436_v62 = vld [vmem:[#allocation4] sm:$0xff] }
 0x34d   : > { %v554_v1 = vpop.xlane.xlu1 %553 }
 0x34e   : > { %v555_v2 = vmax.f32 %v551_v63, %v554_v1 }
 0x350   : > { %v556_v3 = vsub.f32 %v551_v63, %v555_v2  ;;  %637 = vst.msk [vmem:[#allocation2 + $0x8] sm:$0xff] %vm339_vm2, %v555_v2  ;;  %561 = vperm.xlu1 %1213, %v555_v2  }
 0x352   : > { %v557_v40 = vmul.f32 1.442695, %v556_v3 }
 0x355   : > { %v692_v5 = vpop.xlane.xlu0 %691 }
 0x356   : > { %v693_v6 = vmax.f32 %v689_v4, %v692_v5 }
 0x358   : > { %v694_v7 = vsub.f32 %v689_v4, %v693_v6  ;;  %772 = vst.msk [vmem:[#allocation2 + $0x10] sm:$0xff] %vm339_vm2, %v693_v6  ;;  %699 = vperm.xlu0 %1212, %v693_v6  }
 0x35a   : > { %v695_v44 = vmul.f32 1.442695, %v694_v7 }
 0x35d   : > { %v827_v9 = vpop.xlane.xlu1 %826 }
 0x35e   : > { %v828_v10 = vmax.f32 %v824_v8, %v827_v9 }
 0x360   : > { %v829_v12 = vsub.f32 %v824_v8, %v828_v10  ;;  %907 = vst.msk [vmem:[#allocation2 + $0x18] sm:$0xff] %vm339_vm2, %v828_v10  ;;  %834 = vperm.xlu1 %1213, %v828_v10  }
 0x362   : > { %v830_v43 = vmul.f32 1.442695, %v829_v12 }
 0x364   : > { %587 = vrot.lane.b32.xlu1 %v1106_v11, %s1268_s29 }
 0x368   : > { %722 = vrot.lane.b32.xlu1 %v1106_v11, %s1269_s30 }
 0x36c   : > { %857 = vrot.lane.b32.xlu1 %v1106_v11, %s1270_s5  ;;  %v576_v11 = vld [vmem:[#allocation4 + $0x8] sm:$0xff] }
 0x390   : > { %431 = vadd.xlane.f32.xlu1 %v430_v13 }
 0x3cb   : > { %v562_v14 = vpop.permute.xlu1 %561 }
 0x3cc   : > { %v564_v15 = vsub.f32 %v545_v46, %v562_v14  ;;  %v428_v46 = vld [vmem:[#allocation3] sm:$0xff] }
 0x3ce   : > { %v565_v16 = vmul.f32 1.442695, %v564_v15 }
 0x3d0   : > { %1218 = vpow2.f32 %v565_v16 }
 0x3d3   : > { %v700_v17 = vpop.permute.xlu0 %699 }
 0x3d4   : > { %v702_v18 = vsub.f32 %v683_v52, %v700_v17  ;;  %v568_v52 = vld [vmem:[#allocation3 + $0x8] sm:$0xff] }
 0x3d6   : > { %v703_v19 = vmul.f32 1.442695, %v702_v18 }
 0x3d8   : > { %1220 = vpow2.f32 %v703_v19 }
 0x3db   : > { %v835_v20 = vpop.permute.xlu1 %834 }
 0x3dc   : > { %v837_v22 = vsub.f32 %v818_v58, %v835_v20 }
 0x3dd   : > { %v1219_v25 = vpop.eup %1218 }
 0x3de   : > { %v838_v26 = vmul.f32 1.442695, %v837_v22  ;;  %v570_v27 = vsel %vm348_vm0, %v1219_v25, 0.0  ;;  %v583_v30 = vpack.c.bf16 %v1219_v25, %v1219_v25 }
 0x3df   : > { %571 = vadd.xlane.f32.xlu0 %v570_v27  ;;  %v588_v28 = vpop.permute.xlu1 %587  ;;  %v849_v27 = vld [vmem:[#allocation4 + $0x18] sm:$0xff] }
 0x3e0   : > { %1222 = vpow2.f32 %v838_v26  ;;  %v593_v29 = vsel %vm447_vm3, %v588_v28, 0 }
 0x3e1   : > { %1149 = vmatpush3.bf16.msra.mxu0 %v593_v29  ;;  %1224 = vpow2.f32 %v418_v38 }
 0x3e2   : > { %1160 = vmatprep.subr.bf16.mxu0 %v1264_v0  ;;  %1226 = vpow2.f32 %v557_v40 }
 0x3e3   : > { %v723_v31 = vpop.permute.xlu1 %722  ;;  %1228 = vpow2.f32 %v830_v43 }
 0x3e4   : > { %1151 = vmatmul.mubr.msk.bf16.vlgmr.msra.gmra.mxu0 %vm348_vm0, %v583_v30  ;;  %v728_v32 = vsel %vm447_vm3, %v723_v31, 0  ;;  %1230 = vpow2.f32 %v695_v44 }
 0x3e5   : > { %v1221_v33 = vpop.eup %1220  ;;  %1161 = vmatpush3.bf16.msra.mxu0 %v728_v32  ;;  %1162 = vmatprep.mubr.msk.bf16.mxu0 %vm1265_vm1, %v1264_v0 }
 0x3e6   : > { %v708_v34 = vsel %vm348_vm0, %v1221_v33, 0.0  ;;  %1172 = vmatprep.subr.bf16.mxu0 %v1264_v0  ;;  %v721_v36 = vpack.c.bf16 %v1221_v33, %v1221_v33 }
 0x3e7   : > { %709 = vadd.xlane.f32.xlu0 %v708_v34  ;;  %v858_v35 = vpop.permute.xlu1 %857 }
 0x3e8   : > { %v863_v37 = vsel %vm447_vm3, %v858_v35, 0 }
 0x3ec   : > { %1163 = vmatmul.mubr.msk.bf16.vlgmr.msra.gmra.mxu0 %vm348_vm0, %v721_v36 }
 0x3ed   : > { %v1223_v39 = vpop.eup %1222  ;;  %1173 = vmatpush3.bf16.msra.mxu0 %v863_v37  ;;  %1174 = vmatprep.mubr.msk.bf16.mxu0 %vm1265_vm1, %v1264_v0 }
 0x3ee   : > { %v843_v42 = vsel %vm348_vm0, %v1223_v39, 0.0  ;;  %v856_v45 = vpack.c.bf16 %v1223_v39, %v1223_v39  ;;  %v1225_v21 = vpop.eup %1224 }
 0x3ef   : > { %844 = vadd.xlane.f32.xlu1 %v843_v42  ;;  %v1227_v23 = vpop.eup %1226  ;;  %v429_v47 = vmul.f32 %v1225_v21, %v428_v46 }
 0x3f0   : > { %v1229_v24 = vpop.eup %1228  ;;  %v569_v53 = vmul.f32 %v1227_v23, %v568_v52 }
 0x3f1   : > { %v1231_v0 = vpop.eup %1230  ;;  %v842_v63 = vmul.f32 %v1229_v24, %v841_v61 }
 0x3f2   : > { %v707_v57 = vmul.f32 %v1231_v0, %v706_v56 }
 0x3f4   : > { %1175 = vmatmul.mubr.msk.bf16.vlgmr.msra.gmra.mxu0 %vm348_vm0, %v856_v45 }
 0x3fd   : > { %439 = vperm.xlu0 %1212, %v1225_v21  }
 0x400   : > { %579 = vperm.xlu1 %1213, %v1227_v23  }
 0x401   : > { %852 = vperm.xlu0 %1212, %v1229_v24  }
 0x404   : > { %717 = vperm.xlu1 %1213, %v1231_v0  }
 0x419   : > { %v432_v48 = vpop.xlane.xlu1 %431 }
 0x41a   : > { %v433_v49 = vadd.f32 %v432_v48, %v429_v47 }
 0x41c   : > { %435 = vst.msk [vmem:[#allocation3] sm:$0xff] %vm339_vm2, %v433_v49 }
 0x423   : > { %v912_v50 = vld [vmem:[#allocation3] sm:$0xff] }
 0x424   : > { %1232 = vrcp.f32 %v912_v50 }
 0x431   : > { %v1233_v51 = vpop.eup %1232 }
 0x432   : > { %916 = vperm.xlu1 %1213, %v1233_v51  }
 0x468   : > { %v572_v54 = vpop.xlane.xlu0 %571 }
 0x469   : > { %v573_v55 = vadd.f32 %v572_v54, %v569_v53 }
 0x46b   : > { %574 = vst.msk [vmem:[#allocation3 + $0x8] sm:$0xff] %vm339_vm2, %v573_v55 }
 0x470   : > { %v710_v58 = vpop.xlane.xlu0 %709 }
 0x471   : > { %v711_v59 = vadd.f32 %v710_v58, %v707_v57 }
 0x472   : > { %v921_v60 = vld [vmem:[#allocation3 + $0x8] sm:$0xff] }
 0x473   : > { %712 = vst.msk [vmem:[#allocation3 + $0x10] sm:$0xff] %vm339_vm2, %v711_v59  ;;  %1234 = vrcp.f32 %v921_v60 }
 0x478   : > { %v845_v1 = vpop.xlane.xlu1 %844  ;;  %v440_v2 = vpop.permute.xlu0 %439 }
 0x479   : > { %v846_v3 = vadd.f32 %v845_v1, %v842_v63  ;;  %v442_v4 = vmul.f32 %v440_v2, %v436_v62 }
 0x47a   : > { %v930_v5 = vld [vmem:[#allocation3 + $0x10] sm:$0xff] }
 0x47b   : > { %847 = vst.msk [vmem:[#allocation3 + $0x18] sm:$0xff] %vm339_vm2, %v846_v3  ;;  %v491_v6 = vadd.f32 %v1409_v41, %v442_v4  ;;  %1236 = vrcp.f32 %v930_v5  ;;  %v714_v41 = vld [vmem:[#allocation4 + $0x10] sm:$0xff] }
 0x47c   : > { %v580_v12 = vpop.permute.xlu1 %579  ;;  %v853_v28 = vpop.permute.xlu0 %852 }
 0x47d   : > { %492 = vst.msk [vmem:[#allocation4] sm:$0xff] %vm348_vm0, %v491_v6  ;;  %v582_v13 = vmul.f32 %v580_v12, %v576_v11  ;;  %v855_v31 = vmul.f32 %v853_v28, %v849_v27 }
 0x480   : > { %v1235_v7 = vpop.eup %1234  ;;  %v718_v17 = vpop.permute.xlu1 %717 }
 0x481   : > { %925 = vperm.xlu0 %1212, %v1235_v7   ;;  %v720_v20 = vmul.f32 %v718_v17, %v714_v41 }
 0x482   : > { %v939_v8 = vld [vmem:[#allocation3 + $0x18] sm:$0xff] }
 0x483   : > { %1238 = vrcp.f32 %v939_v8 }
 0x484   : > { %v911_v24 = vld [vmem:[#allocation4] sm:$0xff] }
 0x488   : > { %v1237_v9 = vpop.eup %1236 }
 0x489   : > { %934 = vperm.xlu1 %1213, %v1237_v9  }
 0x490   : > { %v1239_v10 = vpop.eup %1238 }
 0x491   : > { %943 = vperm.xlu0 %1212, %v1239_v10  }
 0x4a4   : > { %v629_v14 = vpop.f32.mrf.mxu0 }
 0x4a5   : > { %v635_v15 = vadd.f32 %v629_v14, %v582_v13 }
 0x4a6   : > { %v1152_v16 = vpop.f32.mrf.mxu0 }
 0x4a7   : > { %636 = vst.msk [vmem:[#allocation4 + $0x8] sm:$0xff] %vm348_vm0, %v635_v15 }
 0x4a8   : > { %v632_v18 = vpop.f32.mrf.mxu0 }
 0x4aa   : > { %v1153_v19 = vpop.f32.mrf.mxu0 }
 0x4ac   : > { %v764_v22 = vpop.f32.mrf.mxu0 }
 0x4ad   : > { %v770_v25 = vadd.f32 %v764_v22, %v720_v20  ;;  %v917_v40 = vpop.permute.xlu1 %916 }
 0x4ae   : > { %v1164_v26 = vpop.f32.mrf.mxu0  ;;  %v920_v38 = vld [vmem:[#allocation4 + $0x8] sm:$0xff]  ;;  %v919_v46 = vmul.f32 %v917_v40, %v911_v24 }
 0x4af   : > { %771 = vst.msk [vmem:[#allocation4 + $0x10] sm:$0xff] %vm348_vm0, %v770_v25 }
 0x4b0   : > { %v767_v29 = vpop.f32.mrf.mxu0 }
 0x4b2   : > { %v1165_v30 = vpop.f32.mrf.mxu0 }
 0x4b4   : > { %v899_v32 = vpop.f32.mrf.mxu0 }
 0x4b5   : > { %v905_v33 = vadd.f32 %v899_v32, %v855_v31 }
 0x4b6   : > { %v1176_v34 = vpop.f32.mrf.mxu0  ;;  %v929_v43 = vld [vmem:[#allocation4 + $0x10] sm:$0xff] }
 0x4b7   : > { %906 = vst.msk [vmem:[#allocation4 + $0x18] sm:$0xff] %vm348_vm0, %v905_v33 }
 0x4b8   : > { %v902_v35 = vpop.f32.mrf.mxu0 }
 0x4ba   : > { %v1177_v36 = vpop.f32.mrf.mxu0 }
 0x4be   : > { %v938_v21 = vld [vmem:[#allocation4 + $0x18] sm:$0xff] }
 0x4fc   : > { %v926_v37 = vpop.permute.xlu0 %925 }
 0x4fd   : > { %v928_v39 = vmul.f32 %v926_v37, %v920_v38 }
 0x4ff   : > { %948 = vrot.lane.b32.xlu1 %v928_v39, %s1271_s9 }
 0x504   : > { %v935_v42 = vpop.permute.xlu1 %934 }
 0x505   : > { %v937_v44 = vmul.f32 %v935_v42, %v929_v43 }
 0x507   : > { %952 = vrot.lane.b32.xlu0 %v937_v44, %s1272_s10 }
 0x50c   : > { %v944_v45 = vpop.permute.xlu0 %943 }
 0x50d   : > { %v946_v23 = vmul.f32 %v944_v45, %v938_v21 }
 0x50f   : > { %956 = vrot.lane.b32.xlu1 %v946_v23, %s1273_s11 }
 0x571   : > { %v949_v0 = vpop.permute.xlu1 %948 }
 0x572   : > { %v959_v48 = vsel %vm348_vm0, %v919_v46, %v949_v0 }
 0x579   : > { %v953_v47 = vpop.permute.xlu0 %952 }
 0x57a   : > { %v961_v49 = vsel %vm960_vm4, %v959_v48, %v953_v47 }
 0x581   : > { %v957_v50 = vpop.permute.xlu1 %956 }
 0x582   : > { %v963_v51 = vsel %vm962_vm5, %v961_v49, %v957_v50 }
 0x583   : > { %v964_v52 = vpack.c.bf16 %v963_v51, %v963_v51 }
 0x585   : > { %966 = vst.msk [vmem:[%s333_s14] sm:$0xf] %vm965_vm6, %v964_v52 }
 0x586 PF: > { %s14_s17 = sadd.s32 1, %s1262_s17   ;;  %s1473_s15 = smov %s1258_s16 }
 0x587   : > { %p11_p5 = scmp.ge.s32.totalorder %s14_s17, 4   ;;  %s1474_s16 = smov %s1476_s18 }
 0x589   :  { %13 = sbr.rel (!%p11_p5) target bundleno = 2 (0x2), region = 92 }

// kernel: _lambda_.16
= control target key start
LH: loop header
LB: loop body
LE: loop exit
PB: predicated region body
PF: predicated region fallthrough
CT: control target
= control target key end

     0   :  { %s557_s12 = smov 0   ;;  %s559_s13 = smov 0   ;;  %s601_s0 = inlined_call_operand.vmem [shape: bf16[16,32], index: 0, kind: input, shape index: {}]   ;;  %s602_s1 = inlined_call_operand.vmem [shape: bf16[32,64], index: 1, kind: input, shape index: {}]   ;;  %s603_s2 = inlined_call_operand.vmem [shape: f32[1,64], index: 2, kind: input, shape index: {}]   ;;  %s604_s3 = inlined_call_operand.vmem [shape: bf16[16,64], index: 3, kind: output, shape index: {}]  }
   0x1   :  { %s561_s14 = smov 0  }
   0x2 LB: > { %s32_s15 = sadd.s32 1, %s529_s13  ;;  %p461_p0 = scmp.ge.s32.totalorder %s533_s14, 1  ;;  %s533_s14 = sphi %s561_s14, %s13_s14   ;;  %s529_s13 = sphi %s559_s13, %s606_s13   ;;  %s525_s12 = sphi %s557_s12, %s605_s12  }
   0x3   : > { %p34_p1 = scmp.ge.s32.totalorder %s32_s15, 2  ;;  %p186_p2 = scmp.lt.s32.totalorder %s533_s14, 3 }
   0x5   : > { %s608_s15 = smov (%p34_p1, %s32_s15), 0  ;;  %p187_p3 = pnand %p461_p0, %p186_p2 }
   0x6   : > { %p225_p4 = scmp.lt.s32.totalorder (!%p187_p3), %s525_s12, 1 }
   0x7   : > { %190 = sbr.rel (%p187_p3) target bundleno = 257 (0x101), region = 32 }
   0xc   : > { %vm256_vm0 = vcmask 523264   ;;  %v535_v0 = vmov 0.0   ;;  %v507_v1 = vld [vmem:[%s602_s1 + $0x8] sm:$0xff]   ;;  %vm536_vm1 = vmmov 0   ;;  %v508_v2 = vld [vmem:[%s602_s1] sm:$0xff]   ;;  %s610_s12 = smov (!%p225_p4, %s525_s12), 1 }
   0xd   : > { %257 = vst.msk [vmem:[#allocation2] sm:$0xff] %vm256_vm0, %v535_v0  ;;  %473 = vmatprep.subr.bf16.mxu0 %v535_v0  ;;  %477 = vmatprep.mubr.msk.bf16.mxu0 %vm536_vm1, %v535_v0  ;;  %s462_s20 = sshll.u32 %s610_s12, 2  ;;  %vm276_vm2 = vcmask 261120   ;;  %v467_v10 = vld [vmem:[%s603_s2] ss:$0 sm:$0xff]  ;;  %vm345_vm3 = vcmask 519168  }
   0xe   : > { %474 = vmatpush3.bf16.msra.mxu0 %v507_v1  ;;  %s231_s23 = scalar_lea.vmem %s601_s0, %s462_s20  ;;  %s250_s28 = scalar_lea.vmem %s604_s3, %s462_s20 }
   0xf   : > { %475 = vmatprep.subr.bf16.mxu0 %v535_v0  ;;  %v259_v3 = vld [vmem:[%s231_s23] sm:$0xf] }
  0x12   : > { %476 = vmatpush3.bf16.msra.mxu0 %v508_v2 }
  0x14   : > { %v258_v4 = vld [vmem:[#allocation2] sm:$0xff] }
  0x15   : > { %478 = vmatmul.mubr.msk.bf16.vlgmr.msra.gmra.mxu0 %vm276_vm2, %v259_v3 }
  0xd5   : > { %v314_v5 = vpop.f32.mrf.mxu0 }
  0xd6   : > { %v320_v6 = vadd.f32 %v314_v5, %v258_v4 }
  0xd7   : > { %v479_v7 = vpop.f32.mrf.mxu0 }
  0xd8   : > { %322 = vst.msk [vmem:[#allocation2] sm:$0xff] %vm256_vm0, %v320_v6 }
  0xd9   : > { %v317_v8 = vpop.f32.mrf.mxu0 }
  0xdb   : > { %v480_v9 = vpop.f32.mrf.mxu0 }
  0xdf   : > { %v326_v11 = vld [vmem:[#allocation2] sm:$0xff] }
  0xe0   : > { %v334_v12 = vadd.f32 %v467_v10, %v326_v11 }
  0xe2   : > { %v336_v13 = vmul.f32 0.044715, %v334_v12  ;;  %v335_v19 = vmul.f32 0.5, %v334_v12 }
  0xe4   : > { %v337_v14 = vmul.f32 %v336_v13, %v334_v12 }
  0xe6   : > { %v338_v15 = vmul.f32 %v337_v14, %v334_v12 }
  0xe8   : > { %v339_v16 = vadd.f32 %v338_v15, %v334_v12 }
  0xea   : > { %v340_v17 = vmul.f32 0.7978846, %v339_v16 }
  0xec   : > { %509 = vtanh.f32 %v340_v17 }
  0xf9   : > { %v510_v18 = vpop.eup %509 }
  0xfa   : > { %v342_v20 = vadd.f32 1.0, %v510_v18 }
  0xfc   : > { %v343_v21 = vmul.f32 %v342_v20, %v335_v19 }
  0xfe   : > { %v344_v22 = vpack.c.bf16 %v343_v21, %v343_v21 }
 0x100   : > { %346 = vst.msk [vmem:[%s250_s28] sm:$0xf] %vm345_vm3, %v344_v22 }
 0x101 PF: > { %s13_s14 = sadd.s32 1, %s533_s14   ;;  %s605_s12 = smov %s529_s13 }
 0x102   : > { %p10_p5 = scmp.ge.s32.totalorder %s13_s14, 4   ;;  %s606_s13 = smov %s608_s15 }
 0x104   :  { %12 = sbr.rel (!%p10_p5) target bundleno = 2 (0x2), region = 76 }

// kernel: _lambda_.17
= control target key start
LH: loop header
LB: loop body
LE: loop exit
PB: predicated region body
PF: predicated region fallthrough
CT: control target
= control target key end

     0   :  { %s666_s21 = smov 0   ;;  %s668_s22 = smov 0   ;;  %s732_s0 = inlined_call_operand.vmem [shape: bf16[16,64], index: 0, kind: input, shape index: {}]   ;;  %s733_s1 = inlined_call_operand.vmem [shape: bf16[64,32], index: 1, kind: input, shape index: {}]   ;;  %s734_s2 = inlined_call_operand.vmem [shape: f32[1,32], index: 2, kind: input, shape index: {}]   ;;  %s735_s3 = inlined_call_operand.vmem [shape: bf16[16,32], index: 3, kind: input, shape index: {}]   ;;  %s736_s4 = inlined_call_operand.vmem [shape: f32[1,32], index: 4, kind: input, shape index: {}]   ;;  %s737_s5 = inlined_call_operand.vmem [shape: f32[1,32], index: 5, kind: input, shape index: {}]   ;;  %s738_s6 = inlined_call_operand.vmem [shape: bf16[16,32], index: 6, kind: output, shape index: {}]  }
   0x1   :  { %s670_s23 = smov 0  }
   0x2 LB: > { %s28_s24 = sadd.s32 1, %s623_s22  ;;  %p542_p0 = scmp.ge.s32.totalorder %s627_s23, 1  ;;  %s627_s23 = sphi %s670_s23, %s16_s23   ;;  %s623_s22 = sphi %s668_s22, %s740_s22   ;;  %s619_s21 = sphi %s666_s21, %s739_s21  }
   0x3   : > { %p30_p1 = scmp.ge.s32.totalorder %s28_s24, 2  ;;  %p248_p2 = scmp.lt.s32.totalorder %s627_s23, 3 }
   0x5   : > { %s742_s24 = smov (%p30_p1, %s28_s24), 0  ;;  %p249_p3 = pnand %p542_p0, %p248_p2 }
   0x6   : > { %p288_p4 = scmp.lt.s32.totalorder (!%p249_p3), %s619_s21, 1 }
   0x7   : > { %252 = sbr.rel (%p249_p3) target bundleno = 547 (0x223), region = 44 }
   0xc   : > { %v599_v0 = vld [vmem:[%s733_s1 + $0x18] sm:$0xff]   ;;  %v629_v1 = vmov 0.0   ;;  %v600_v2 = vld [vmem:[%s733_s1 + $0x10] sm:$0xff]   ;;  %vm630_vm0 = vmmov 0   ;;  %s744_s21 = smov (!%p288_p4, %s619_s21), 1  ;;  %vm314_vm1 = vcmask 261120  }
   0xd   : > { %561 = vmatprep.subr.bf16.mxu0 %v629_v1  ;;  %569 = vmatprep.mubr.msk.bf16.mxu0 %vm630_vm0, %v629_v1  ;;  %315 = vst.msk [vmem:[#allocation2] sm:$0xff] %vm314_vm1, %v629_v1  ;;  %v601_v3 = vld [vmem:[%s733_s1 + $0x8] sm:$0xff]   ;;  %s694_s7 = sshll.u32 %s744_s21, 2  ;;  %v602_v4 = vld [vmem:[%s733_s1] sm:$0xff]   ;;  %vm350_vm2 = vcmask 523264   ;;  %vm443_vm3 = vcmask 257024  }
   0xe   : > { %562 = vmatpush3.bf16.msra.mxu0 %v599_v0  ;;  %s294_s12 = scalar_lea.vmem %s732_s0, %s694_s7  ;;  %s304_s15 = scalar_lea.vmem %s735_s3, %s694_s7  ;;  %v551_v13 = vld [vmem:[%s734_s2] ss:$0 sm:$0xff] }
   0xf   : > { %563 = vmatprep.subr.bf16.mxu0 %v629_v1  ;;  %v317_v5 = vld [vmem:[%s294_s12] sm:$0xf]  ;;  %s308_s27 = scalar_lea.vmem %s738_s6, %s694_s7 }
  0x10   : > { %v409_v12 = vld [vmem:[%s304_s15] sm:$0xf] }
  0x11   : > { %v410_v14 = vunpack.c.l.bf16 %v409_v12  ;;  %v552_v28 = vld [vmem:[%s736_s4] ss:$0 sm:$0xff] }
  0x12   : > { %564 = vmatpush3.bf16.msra.mxu0 %v600_v2  ;;  %v553_v30 = vld [vmem:[%s737_s5] ss:$0 sm:$0xff] }
  0x13   : > { %565 = vmatprep.subr.bf16.mxu0 %v629_v1 }
  0x14   : > { %v316_v6 = vld [vmem:[#allocation2] sm:$0xff] }
  0x16   : > { %566 = vmatpush3.bf16.msra.mxu0 %v601_v3 }
  0x17   : > { %567 = vmatprep.subr.bf16.mxu0 %v629_v1 }
  0x1a   : > { %568 = vmatpush3.bf16.msra.mxu0 %v602_v4 }
  0x1d   : > { %570 = vmatmul.mubr.msk.bf16.vlgmr.msra.gmra.mxu0 %vm350_vm2, %v317_v5 }
  0xdd   : > { %v388_v7 = vpop.f32.mrf.mxu0 }
  0xde   : > { %v394_v8 = vadd.f32 %v388_v7, %v316_v6 }
  0xdf   : > { %v571_v9 = vpop.f32.mrf.mxu0 }
  0xe0   : > { %396 = vst.msk [vmem:[#allocation2] sm:$0xff] %vm314_vm1, %v394_v8 }
  0xe1   : > { %v391_v10 = vpop.f32.mrf.mxu0 }
  0xe3   : > { %v572_v11 = vpop.f32.mrf.mxu0 }
  0xe7   : > { %v400_v15 = vld [vmem:[#allocation2] sm:$0xff] }
  0xe8   : > { %v408_v16 = vadd.f32 %v551_v13, %v400_v15 }
  0xea   : > { %v411_v17 = vadd.f32 %v410_v14, %v408_v16 }
  0xec   : > { %v412_v18 = vsel %vm314_vm1, %v411_v17, 0.0 }
  0xed   : > { %413 = vadd.xlane.f32.xlu0 %v412_v18 }
 0x176   : > { %v414_v19 = vpop.xlane.xlu0 %413 }
 0x177   : > { %v416_v20 = vmul.f32 0.03125, %v414_v19 }
 0x179   : > { %v417_v21 = vsub.f32 %v411_v17, %v416_v20 }
 0x17b   : > { %v418_v22 = vmul.f32 %v417_v21, %v417_v21 }
 0x17d   : > { %v419_v23 = vsel %vm314_vm1, %v418_v22, 0.0 }
 0x17e   : > { %420 = vadd.xlane.f32.xlu0 %v419_v23 }
 0x207   : > { %v421_v24 = vpop.xlane.xlu0 %420 }
 0x208   : > { %v422_v25 = vmul.f32 0.03125, %v421_v24 }
 0x20a   : > { %v423_v26 = vadd.f32 1e-12, %v422_v25 }
 0x20c   : > { %603 = vrsqrt.f32 %v423_v26 }
 0x219   : > { %v604_v27 = vpop.eup %603 }
 0x21a   : > { %v425_v29 = vmul.f32 %v604_v27, %v417_v21 }
 0x21c   : > { %v433_v31 = vmul.f32 %v552_v28, %v425_v29 }
 0x21e   : > { %v441_v32 = vadd.f32 %v553_v30, %v433_v31 }
 0x220   : > { %v442_v33 = vpack.c.bf16 %v441_v32, %v441_v32 }
 0x222   : > { %444 = vst.msk [vmem:[%s308_s27] sm:$0xf] %vm443_vm3, %v442_v33 }
 0x223 PF: > { %s16_s23 = sadd.s32 1, %s627_s23   ;;  %s739_s21 = smov %s623_s22 }
 0x224   : > { %p13_p5 = scmp.ge.s32.totalorder %s16_s23, 4   ;;  %s740_s22 = smov %s742_s24 }
 0x226   :  { %15 = sbr.rel (!%p13_p5) target bundleno = 2 (0x2), region = 88 }

// kernel: _lambda_.23
= control target key start
LH: loop header
LB: loop body
LE: loop exit
PB: predicated region body
PF: predicated region fallthrough
CT: control target
= control target key end

     0   :  { %v234_v1 = vmov 0.0   ;;  %vm235_vm0 = vmmov 0   ;;  %s293_s0 = inlined_call_operand.vmem [shape: bf16[2,32], index: 0, kind: input, shape index: {}]   ;;  %s294_s1 = inlined_call_operand.vmem [shape: bf16[32,32], index: 1, kind: input, shape index: {}]   ;;  %s295_s2 = inlined_call_operand.vmem [shape: f32[1,32], index: 2, kind: input, shape index: {}]   ;;  %s296_s3 = inlined_call_operand.vmem [shape: bf16[32,128], index: 3, kind: input, shape index: {}]   ;;  %s297_s4 = inlined_call_operand.vmem [shape: f32[1,128], index: 4, kind: input, shape index: {}]   ;;  %s298_s5 = inlined_call_operand.hbm [shape: f32[2,128], index: 5, kind: output, shape index: {}]  }
   0x1   :  { %v206_v0 = vld [vmem:[%s294_s1 + $0x8] sm:$0xff]   ;;  %187 = vmatprep.subr.bf16.mxu0 %v234_v1  ;;  %195 = vmatprep.subr.bf16.mxu1 %v234_v1  ;;  %v207_v2 = vld [vmem:[%s294_s1] sm:$0xff]  }
   0x2   :  { %188 = vmatpush3.bf16.msra.mxu0 %v206_v0  ;;  %191 = vmatprep.mubr.msk.bf16.mxu0 %vm235_vm0, %v234_v1 }
   0x3   :  { %189 = vmatprep.subr.bf16.mxu0 %v234_v1  ;;  %199 = vmatprep.mubr.msk.bf16.mxu1 %vm235_vm0, %v234_v1 }
   0x4   :  { %10 = vsyncpa [#allocation3], 0  ;;  %v22_v3 = vld [vmem:[%s293_s0] sm:$0x1]  ;;  %vm46_vm1 = vcmask 261120   ;;  %v208_v4 = vld [vmem:[%s296_s3 + $0x8] sm:$0xff]  }
   0x5   :  { %196 = vmatpush3.bf16.msra.mxu1 %v208_v4  ;;  %v209_v5 = vld [vmem:[%s296_s3] sm:$0xff]   ;;  %s236_s3 = smov [#allocation2]  }
   0x6   :  { %190 = vmatpush3.bf16.msra.mxu0 %v207_v2  ;;  %197 = vmatprep.subr.bf16.mxu1 %v234_v1  ;;  %v173_v6 = vld [vmem:[%s295_s2] ss:$0 sm:$0xff]  ;;  %s165_s30 = sshll.u32 %s236_s3, 4  ;;  %s166_s30 = int_to_ptr.vmem [resolvable:$true] %s165_s30 }
   0x7   :  { %v177_v14 = vld [vmem:[%s297_s4] ss:$0 sm:$0xff]  ;;  %s212_s2 = scalar_lea.vmem %s166_s30, 32  ;;  %p217_p1 = scmp.lt.s32.totalorder %s166_s30, %s166_s30 }
   0x8   :  { %p213_p0 = scmp.ne.s32.totalorder %s166_s30, %s212_s2  ;;  %p218_p2 = scmp.lt.s32.totalorder %s212_s2, %s212_s2 }
   0x9   :  { %192 = vmatmul.mubr.msk.bf16.vlgmr.msra.gmra.mxu0 %vm46_vm1, %v22_v3  ;;  %198 = vmatpush3.bf16.msra.mxu1 %v209_v5 }
   0xa   :  { %p219_p3 = por %p218_p2, %p217_p1 }
   0xc   :  { %p220_p4 = pnand %p219_p3, %p213_p0 }
  0xc9   :  { %v84_v7 = vpop.f32.mrf.mxu0 }
  0xca   :  { %v85_v8 = vadd.f32 %v173_v6, %v84_v7 }
  0xcb   :  { %v193_v9 = vpop.f32.mrf.mxu0 }
  0xcc   :  { %210 = vtanh.f32 %v85_v8 }
  0xcd   :  { %v87_v10 = vpop.f32.mrf.mxu0 }
  0xcf   :  { %v194_v11 = vpop.f32.mrf.mxu0 }
  0xd9   :  { %v211_v12 = vpop.eup %210 }
  0xda   :  { %v91_v13 = vpack.c.bf16 %v211_v12, %v211_v12 }
  0xdc   :  { %200 = vmatmul.mubr.msk.bf16.vlgmr.msra.gmra.mxu1 %vm46_vm1, %v91_v13 }
 0x19c   :  { %v152_v15 = vpop.f32.mrf.mxu1 }
 0x19d   :  { %v153_v16 = vadd.f32 %v177_v14, %v152_v15 }
 0x19e   :  { %v201_v17 = vpop.f32.mrf.mxu1 }
 0x19f   :  { %158 = vst [vmem:[#allocation2] sm:$0x3] %v153_v16 }
 0x1a0   :  { %v155_v18 = vpop.f32.mrf.mxu1 }
 0x1a1   :  { %223 = shalt.err (!%p220_p4)
}
 0x1a2   :  { %168 = dma.vmem_to_hbm [thread:$0]  %s166_s30, 32, %s298_s5, [#allocation3]   ;;  %v202_v19 = vpop.f32.mrf.mxu1 }
 0x1a3   :  { %232 = dma.done.wait [#allocation3], 32  }
 0x1a4   :  { %233 = vsyncadd [#allocation3], 4294967264 }
 0x1a5   :  { %172 = vsyncpa [#allocation3], 1 }

</bundles_post_ra>
